<compile_context>
chip_gen: v7x
topology: tpu7x:2x2x1
jax: 0.10.0
libtpu: 0.0.40
codegen_flags: <defaults>
</compile_context>

<pallas_src>
import math
from functools import partial

import jax
import jax.numpy as jnp
from jax.experimental import pallas as pl
from jax.experimental.pallas import tpu as pltpu

F32 = jnp.float32

# Whole-array-in-VMEM spec (all operands here are KB-sized; no grid tiling needed).
VMEM_SPEC = pl.BlockSpec(memory_space=pltpu.MemorySpace.VMEM)


# ----------------------------- numerics helpers -----------------------------
def _sigmoid(x):
    # exact sigmoid via tanh: single EUP op, no exp overflow / divide
    return 0.5 * (jnp.tanh(0.5 * x) + 1.0)


def _softplus(x):
    # numerically stable softplus (matches torch.nn.functional.softplus, beta=1)
    return jnp.maximum(x, 0.0) + jnp.log1p(jnp.exp(-jnp.abs(x)))


# ------------------------------ fused kernel --------------------------------
def mpnn_kernel(
    # graph inputs
    onehot_ref, env_idx_ref, env_dst_ref, edge_idx_ref, env_len_ref, edge_len_ref,
    # embedding weights
    ne_w_ref, ne_b_ref, bessel_w_ref,
    ee_w1_ref, ee_b1_ref, ee_w2_ref, ee_b2_ref,
    # stacked per-layer CGConv weights
    wn_ref, bn_ref, we_ref, be_ref, lng_ref, lnb_ref,
    # outputs
    node_o_ref, edge_o_ref,
    *, r_max, n_layer, n_nodes, n_node, n_edge, e_env, e_edge,
):
    dot = partial(jnp.dot, preferred_element_type=F32)

    # ---- node embedding: one_hot(atom) @ W + b (single MXU pass) ----
    node_f = dot(onehot_ref[...], ne_w_ref[...]) + ne_b_ref[...]          # (N, n_node)

    # ---- one-hot gather / scatter matrices from integer indices (layer-invariant) ----
    def gather_mat(idx_col, e):
        # idx_col: (e, 1) int32 -> (e, N) f32 one-hot selection matrix
        iota = jax.lax.broadcasted_iota(jnp.int32, (e, n_nodes), 1)
        return jnp.where(idx_col == iota, 1.0, 0.0).astype(F32)

    env_idx = env_idx_ref[...]                                            # (E_env, 2)
    edge_idx = edge_idx_ref[...]                                          # (E_edge, 2)
    g_env_i = gather_mat(env_idx[:, 0:1], e_env)
    g_env_j = gather_mat(env_idx[:, 1:2], e_env)
    g_edge_i = gather_mat(edge_idx[:, 0:1], e_edge)
    g_edge_j = gather_mat(edge_idx[:, 1:2], e_edge)
    # aggregation (scatter-add) matrix: s[n, e] = 1 iff env target node of edge e is n
    iota_n = jax.lax.broadcasted_iota(jnp.int32, (n_nodes, e_env), 0)
    s_env = jnp.where(env_dst_ref[...] == iota_n, 1.0, 0.0).astype(F32)   # (N, E_env)

    # row-stacked (env ++ edge) gather matrices for the shared-weight paths
    g_all_i = jnp.concatenate([g_env_i, g_edge_i], axis=0)                # (E_all, N)
    g_all_j = jnp.concatenate([g_env_j, g_edge_j], axis=0)

    # ---- Bessel basis for both graphs (row-stacked): 2/r_max * sin(w*x/r_max) / x ----
    lens = jnp.concatenate([env_len_ref[...], edge_len_ref[...]], axis=0)  # (E_all, 1)
    inv_len = pl.reciprocal(lens, approx=True)                             # EUP, no divide
    bw = bessel_w_ref[...]                                                 # (1, n_basis)
    bes = (2.0 / r_max) * jnp.sin(lens * (bw * (1.0 / r_max))) * inv_len   # (E_all, n_basis)

    # ---- edge_emb ResNet (env ++ edge share weights; one matmul chain) ----
    ni = dot(g_all_i, node_f)                                              # (E_all, n_node)
    nj = dot(g_all_j, node_f)
    z0 = jnp.concatenate([ni, nj, bes], axis=-1)            # (E_all, 2*n_node + n_basis)
    h = jnp.tanh(dot(z0, ee_w1_ref[...]) + ee_b1_ref[...])
    feat = dot(h, ee_w2_ref[...]) + ee_b2_ref[...]                         # (E_all, n_edge)
    env_f = feat[:e_env, :]
    edge_f = feat[e_env:, :]

    # ---- CGConv layers (static unroll; weights via static slices of the stacks) ----
    for l in range(n_layer):
        w_node = wn_ref[l]            # (d_cat, 2*n_node)  Wf||Ws packed column-wise
        b_node = bn_ref[l]            # (1, 2*n_node)
        w_edge = we_ref[l]            # (d_cat, 2*n_edge)
        b_edge = be_ref[l]
        gamma = lng_ref[l]            # (1, n_node)
        beta = lnb_ref[l]

        # message over env graph: LayerNorm(sigmoid(Wf z) * softplus(Ws z)),
        # z = [node_i | node_j | env_f] assembled once -> single K=96 MXU dot
        z_ik = jnp.concatenate(
            [dot(g_env_i, node_f), dot(g_env_j, node_f), env_f], axis=-1)
        xw = dot(z_ik, w_node) + b_node                                    # (E_env, 2*n_node)
        y = _sigmoid(xw[:, :n_node]) * _softplus(xw[:, n_node:])
        mean = jnp.mean(y, axis=-1, keepdims=True)
        var = jnp.mean((y - mean) ** 2, axis=-1, keepdims=True)
        msg = (y - mean) * jax.lax.rsqrt(var + 1e-5) * gamma + beta        # (E_env, n_node)

        # propagate(aggr='add') onto env targets as an MXU one-hot matmul + residual
        node_f = node_f + dot(s_env, msg)                                  # (N, n_node)

        # env & edge feature updates (shared lin_edge_f/s), env ++ edge row-stacked;
        # input ordering [node_i | feat | node_j] as in the torch reference
        feat_all = jnp.concatenate([env_f, edge_f], axis=0)                # (E_all, n_edge)
        z_e = jnp.concatenate(
            [dot(g_all_i, node_f), feat_all, dot(g_all_j, node_f)], axis=-1)
        xw_e = dot(z_e, w_edge) + b_edge                                   # (E_all, 2*n_edge)
        out = _sigmoid(xw_e[:, :n_edge]) * _softplus(xw_e[:, n_edge:])
        env_f = out[:e_env, :]
        edge_f = out[e_env:, :]

    node_o_ref[...] = node_f
    edge_o_ref[...] = edge_f


# ------------------------------ parameter init -------------------------------
def _init_linear(key, fan_in, fan_out):
    # torch.nn.Linear default: U(-1/sqrt(fan_in), 1/sqrt(fan_in)) for W and b
    kw, kb = jax.random.split(key)
    bound = 1.0 / math.sqrt(fan_in)
    w = jax.random.uniform(kw, (fan_in, fan_out), F32, -bound, bound)
    b = jax.random.uniform(kb, (1, fan_out), F32, -bound, bound)
    return w, b


def init_mpnn_params(key, *, n_atom, n_node, n_edge, n_basis, hidden, n_layer):
    keys = jax.random.split(key, 3 + 4 * n_layer)
    params = {}
    # node_emb: Linear(n_atom -> n_node)
    params["node_emb_w"], params["node_emb_b"] = _init_linear(keys[0], n_atom, n_node)
    # bessel weights (trainable=True): linspace(1, n_basis) * pi
    params["bessel_w"] = (
        jnp.linspace(1.0, n_basis, n_basis, dtype=F32) * math.pi
    ).reshape(1, n_basis)
    # edge_emb ResNet: single block {in: 2*n_node + n_basis, hidden, out: n_edge}
    d_in = 2 * n_node + n_basis
    params["edge_emb_w1"], params["edge_emb_b1"] = _init_linear(keys[1], d_in, hidden)
    params["edge_emb_w2"], params["edge_emb_b2"] = _init_linear(keys[2], hidden, n_edge)
    # CGConv layers: pack Wf||Ws column-wise; stack all layers along a leading axis
    d_cat = 2 * n_node + n_edge
    wn, bn, we, be, lg, lb = [], [], [], [], [], []
    for l in range(n_layer):
        k = keys[3 + 4 * l: 3 + 4 * (l + 1)]
        wef, bef = _init_linear(k[0], d_cat, n_edge)   # lin_edge_f
        wes, bes = _init_linear(k[1], d_cat, n_edge)   # lin_edge_s
        wnf, bnf = _init_linear(k[2], d_cat, n_node)   # lin_node_f
        wns, bns = _init_linear(k[3], d_cat, n_node)   # lin_node_s
        we.append(jnp.concatenate([wef, wes], axis=1))   # (d_cat, 2*n_edge)
        be.append(jnp.concatenate([bef, bes], axis=1))
        wn.append(jnp.concatenate([wnf, wns], axis=1))   # (d_cat, 2*n_node)
        bn.append(jnp.concatenate([bnf, bns], axis=1))
        lg.append(jnp.ones((1, n_node), F32))            # LayerNorm affine defaults
        lb.append(jnp.zeros((1, n_node), F32))
    params["w_node_all"] = jnp.stack(wn)       # (L, d_cat, 2*n_node)
    params["b_node_all"] = jnp.stack(bn)       # (L, 1, 2*n_node)
    params["w_edge_all"] = jnp.stack(we)       # (L, d_cat, 2*n_edge)
    params["b_edge_all"] = jnp.stack(be)       # (L, 1, 2*n_edge)
    params["ln_gamma_all"] = jnp.stack(lg)     # (L, 1, n_node)
    params["ln_beta_all"] = jnp.stack(lb)      # (L, 1, n_node)
    return params


# --------------------------------- forward -----------------------------------
def mpnn_forward(params, atom_types, pos, env_index, edge_index, *, r_max):
    n_nodes = atom_types.shape[0]
    n_atom = params["node_emb_w"].shape[0]
    n_node = params["node_emb_w"].shape[1]
    n_edge = params["edge_emb_w2"].shape[1]
    n_layer = params["w_node_all"].shape[0]
    e_env = env_index.shape[1]
    e_edge = edge_index.shape[1]

    # OneHotAtomEncoding + pair lengths (AtomicDataDict.with_env/edge_vectors) — cheap
    # one-time preprocessing; everything downstream runs inside one fused kernel.
    onehot_atoms = jax.nn.one_hot(atom_types, n_atom, dtype=F32)
    env_len = jnp.linalg.norm(
        pos[env_index[1]] - pos[env_index[0]], axis=-1, keepdims=True)
    edge_len = jnp.linalg.norm(
        pos[edge_index[1]] - pos[edge_index[0]], axis=-1, keepdims=True)

    env_idx = env_index.T.astype(jnp.int32)                 # (E_env, 2)
    edge_idx = edge_index.T.astype(jnp.int32)               # (E_edge, 2)
    env_dst = env_index[1].reshape(1, e_env).astype(jnp.int32)  # (1, E_env) for scatter

    kernel = partial(
        mpnn_kernel,
        r_max=float(r_max), n_layer=n_layer, n_nodes=n_nodes,
        n_node=n_node, n_edge=n_edge, e_env=e_env, e_edge=e_edge,
    )
    node_f, edge_f = pl.pallas_call(
        kernel,
        out_shape=(
            jax.ShapeDtypeStruct((n_nodes, n_node), F32),
            jax.ShapeDtypeStruct((e_edge, n_edge), F32),
        ),
        in_specs=[VMEM_SPEC] * 19,
        out_specs=(VMEM_SPEC, VMEM_SPEC),
    )(
        onehot_atoms, env_idx, env_dst, edge_idx, env_len, edge_len,
        params["node_emb_w"], params["node_emb_b"], params["bessel_w"],
        params["edge_emb_w1"], params["edge_emb_b1"],
        params["edge_emb_w2"], params["edge_emb_b2"],
        params["w_node_all"], params["b_node_all"],
        params["w_edge_all"], params["b_edge_all"],
        params["ln_gamma_all"], params["ln_beta_all"],
    )
    return node_f, edge_f


# ----------------------------------- main -------------------------------------
if __name__ == "__main__":
    # model config (small)
    r_max = 5.0
    n_atom = 4
    n_node = 32
    n_edge = 32
    n_basis = 8
    hidden = 32  # edge_net['neurons'] = [32]
    n_layer = 2

    # graph sizes
    N = 8        # atoms
    E_ENV = 16   # env pairs
    E_EDGE = 16  # bond pairs

    key = jax.random.PRNGKey(0)
    kp, ka, kpos, ke1, ke2, ko1, ko2 = jax.random.split(key, 7)

    params = init_mpnn_params(
        kp,
        n_atom=n_atom,
        n_node=n_node,
        n_edge=n_edge,
        n_basis=n_basis,
        hidden=hidden,
        n_layer=n_layer,
    )

    atom_types = jax.random.randint(ka, (N,), 0, n_atom)
    pos = jax.random.uniform(kpos, (N, 3), F32, 0.0, 4.0)

    # build index pairs with i != j so lengths are strictly positive
    env_src = jax.random.randint(ke1, (E_ENV,), 0, N)
    env_off = jax.random.randint(ke2, (E_ENV,), 1, N)
    env_index = jnp.stack([env_src, (env_src + env_off) % N], axis=0)

    edge_src = jax.random.randint(ko1, (E_EDGE,), 0, N)
    edge_off = jax.random.randint(ko2, (E_EDGE,), 1, N)
    edge_index = jnp.stack([edge_src, (edge_src + edge_off) % N], axis=0)

    fwd = jax.jit(partial(mpnn_forward, r_max=r_max))
    node_features, edge_features = fwd(params, atom_types, pos, env_index, edge_index)
    jax.block_until_ready((node_features, edge_features))

    assert node_features.shape == (N, n_node)
    assert edge_features.shape == (E_EDGE, n_edge)
    assert bool(jnp.all(jnp.isfinite(node_features)))
    assert bool(jnp.all(jnp.isfinite(edge_features)))

    print("KERNEL_OK")
</pallas_src>

<mosaic_0001>
module attributes {stable_mosaic.version = 11 : i64} {
  func.func @mpnn_kernel(%arg0: memref<8x4xf32, #tpu.memory_space<vmem>>, %arg1: memref<16x2xi32, #tpu.memory_space<vmem>>, %arg2: memref<1x16xi32, #tpu.memory_space<vmem>>, %arg3: memref<16x2xi32, #tpu.memory_space<vmem>>, %arg4: memref<16x1xf32, #tpu.memory_space<vmem>>, %arg5: memref<16x1xf32, #tpu.memory_space<vmem>>, %arg6: memref<4x32xf32, #tpu.memory_space<vmem>>, %arg7: memref<1x32xf32, #tpu.memory_space<vmem>>, %arg8: memref<1x8xf32, #tpu.memory_space<vmem>>, %arg9: memref<72x32xf32, #tpu.memory_space<vmem>>, %arg10: memref<1x32xf32, #tpu.memory_space<vmem>>, %arg11: memref<32x32xf32, #tpu.memory_space<vmem>>, %arg12: memref<1x32xf32, #tpu.memory_space<vmem>>, %arg13: memref<2x96x64xf32, #tpu.memory_space<vmem>>, %arg14: memref<2x1x64xf32, #tpu.memory_space<vmem>>, %arg15: memref<2x96x64xf32, #tpu.memory_space<vmem>>, %arg16: memref<2x1x64xf32, #tpu.memory_space<vmem>>, %arg17: memref<2x1x32xf32, #tpu.memory_space<vmem>>, %arg18: memref<2x1x32xf32, #tpu.memory_space<vmem>>, %arg19: memref<8x32xf32, #tpu.memory_space<vmem>>, %arg20: memref<16x32xf32, #tpu.memory_space<vmem>>) attributes {dimension_semantics = [], scalar_prefetch = 0 : i64, scratch_operands = 0 : i64, tpu.core_type = #tpu.core_type<tc>} {
    %c0 = arith.constant 0 : index
    %c0_0 = arith.constant 0 : index
    %0 = vector.load %arg0[%c0, %c0_0] : memref<8x4xf32, #tpu.memory_space<vmem>>, vector<8x4xf32>
    %c0_1 = arith.constant 0 : index
    %c0_2 = arith.constant 0 : index
    %1 = vector.load %arg6[%c0_1, %c0_2] : memref<4x32xf32, #tpu.memory_space<vmem>>, vector<4x32xf32>
    %cst = arith.constant dense<0.000000e+00> : vector<8x32xf32>
    %2 = tpu.matmul %0, %1, %cst {dimension_numbers = #tpu.dot_dimension_numbers<[1], [0], [0], [1], [0, 0, 1, 1], [], []>} : vector<8x4xf32>, vector<4x32xf32>, vector<8x32xf32> -> vector<8x32xf32>
    %c0_3 = arith.constant 0 : index
    %c0_4 = arith.constant 0 : index
    %3 = vector.load %arg7[%c0_3, %c0_4] : memref<1x32xf32, #tpu.memory_space<vmem>>, vector<1x32xf32>
    %4 = vector.broadcast %3 : vector<1x32xf32> to vector<8x32xf32>
    %5 = arith.addf %2, %4 : vector<8x32xf32>
    %c0_5 = arith.constant 0 : index
    %c0_6 = arith.constant 0 : index
    %6 = vector.load %arg1[%c0_5, %c0_6] : memref<16x2xi32, #tpu.memory_space<vmem>>, vector<16x2xi32>
    %c0_7 = arith.constant 0 : index
    %c0_8 = arith.constant 0 : index
    %7 = vector.load %arg3[%c0_7, %c0_8] : memref<16x2xi32, #tpu.memory_space<vmem>>, vector<16x2xi32>
    %8 = vector.extract_strided_slice %6 {offsets = [0, 0], sizes = [16, 1], strides = [1, 1]} : vector<16x2xi32> to vector<16x1xi32>
    %9 = tpu.iota {dimensions = array<i32: 1>} : vector<16x8xi32>
    %10 = vector.broadcast %8 : vector<16x1xi32> to vector<16x8xi32>
    %11 = arith.cmpi eq, %10, %9 : vector<16x8xi32>
    %cst_9 = arith.constant 1.000000e+00 : f32
    %cst_10 = arith.constant 0.000000e+00 : f32
    %12 = vector.broadcast %cst_9 : f32 to vector<16x8xf32>
    %13 = vector.broadcast %cst_10 : f32 to vector<16x8xf32>
    %14 = arith.select %11, %12, %13 : vector<16x8xi1>, vector<16x8xf32>
    %15 = vector.extract_strided_slice %6 {offsets = [0, 1], sizes = [16, 1], strides = [1, 1]} : vector<16x2xi32> to vector<16x1xi32>
    %16 = tpu.iota {dimensions = array<i32: 1>} : vector<16x8xi32>
    %17 = vector.broadcast %15 : vector<16x1xi32> to vector<16x8xi32>
    %18 = arith.cmpi eq, %17, %16 : vector<16x8xi32>
    %cst_11 = arith.constant 1.000000e+00 : f32
    %cst_12 = arith.constant 0.000000e+00 : f32
    %19 = vector.broadcast %cst_11 : f32 to vector<16x8xf32>
    %20 = vector.broadcast %cst_12 : f32 to vector<16x8xf32>
    %21 = arith.select %18, %19, %20 : vector<16x8xi1>, vector<16x8xf32>
    %22 = vector.extract_strided_slice %7 {offsets = [0, 0], sizes = [16, 1], strides = [1, 1]} : vector<16x2xi32> to vector<16x1xi32>
    %23 = tpu.iota {dimensions = array<i32: 1>} : vector<16x8xi32>
    %24 = vector.broadcast %22 : vector<16x1xi32> to vector<16x8xi32>
    %25 = arith.cmpi eq, %24, %23 : vector<16x8xi32>
    %cst_13 = arith.constant 1.000000e+00 : f32
    %cst_14 = arith.constant 0.000000e+00 : f32
    %26 = vector.broadcast %cst_13 : f32 to vector<16x8xf32>
    %27 = vector.broadcast %cst_14 : f32 to vector<16x8xf32>
    %28 = arith.select %25, %26, %27 : vector<16x8xi1>, vector<16x8xf32>
    %29 = vector.extract_strided_slice %7 {offsets = [0, 1], sizes = [16, 1], strides = [1, 1]} : vector<16x2xi32> to vector<16x1xi32>
    %30 = tpu.iota {dimensions = array<i32: 1>} : vector<16x8xi32>
    %31 = vector.broadcast %29 : vector<16x1xi32> to vector<16x8xi32>
    %32 = arith.cmpi eq, %31, %30 : vector<16x8xi32>
    %cst_15 = arith.constant 1.000000e+00 : f32
    %cst_16 = arith.constant 0.000000e+00 : f32
    %33 = vector.broadcast %cst_15 : f32 to vector<16x8xf32>
    %34 = vector.broadcast %cst_16 : f32 to vector<16x8xf32>
    %35 = arith.select %32, %33, %34 : vector<16x8xi1>, vector<16x8xf32>
    %36 = tpu.iota {dimensions = array<i32: 0>} : vector<8x16xi32>
    %c0_17 = arith.constant 0 : index
    %c0_18 = arith.constant 0 : index
    %37 = vector.load %arg2[%c0_17, %c0_18] : memref<1x16xi32, #tpu.memory_space<vmem>>, vector<1x16xi32>
    %38 = vector.broadcast %37 : vector<1x16xi32> to vector<8x16xi32>
    %39 = arith.cmpi eq, %38, %36 : vector<8x16xi32>
    %cst_19 = arith.constant 1.000000e+00 : f32
    %cst_20 = arith.constant 0.000000e+00 : f32
    %40 = vector.broadcast %cst_19 : f32 to vector<8x16xf32>
    %41 = vector.broadcast %cst_20 : f32 to vector<8x16xf32>
    %42 = arith.select %39, %40, %41 : vector<8x16xi1>, vector<8x16xf32>
    %43 = tpu.concatenate %14, %28 in 0 : vector<16x8xf32>, vector<16x8xf32> -> vector<32x8xf32>
    %44 = tpu.concatenate %21, %35 in 0 : vector<16x8xf32>, vector<16x8xf32> -> vector<32x8xf32>
    %c0_21 = arith.constant 0 : index
    %c0_22 = arith.constant 0 : index
    %45 = vector.load %arg4[%c0_21, %c0_22] : memref<16x1xf32, #tpu.memory_space<vmem>>, vector<16x1xf32>
    %c0_23 = arith.constant 0 : index
    %c0_24 = arith.constant 0 : index
    %46 = vector.load %arg5[%c0_23, %c0_24] : memref<16x1xf32, #tpu.memory_space<vmem>>, vector<16x1xf32>
    %47 = tpu.concatenate %45, %46 in 0 : vector<16x1xf32>, vector<16x1xf32> -> vector<32x1xf32>
    %48 = tpu.reciprocal %47 {approx = true} : vector<32x1xf32> -> vector<32x1xf32>
    %c0_25 = arith.constant 0 : index
    %c0_26 = arith.constant 0 : index
    %49 = vector.load %arg8[%c0_25, %c0_26] : memref<1x8xf32, #tpu.memory_space<vmem>>, vector<1x8xf32>
    %cst_27 = arith.constant 2.000000e-01 : f32
    %50 = vector.broadcast %cst_27 : f32 to vector<1x8xf32>
    %51 = arith.mulf %49, %50 : vector<1x8xf32>
    %52 = vector.broadcast %47 : vector<32x1xf32> to vector<32x8xf32>
    %53 = vector.broadcast %51 : vector<1x8xf32> to vector<32x8xf32>
    %54 = arith.mulf %52, %53 : vector<32x8xf32>
    %55 = math.sin %54 : vector<32x8xf32>
    %cst_28 = arith.constant 4.000000e-01 : f32
    %56 = vector.broadcast %cst_28 : f32 to vector<32x8xf32>
    %57 = arith.mulf %56, %55 : vector<32x8xf32>
    %58 = vector.broadcast %48 : vector<32x1xf32> to vector<32x8xf32>
    %59 = arith.mulf %57, %58 : vector<32x8xf32>
    %cst_29 = arith.constant dense<0.000000e+00> : vector<32x32xf32>
    %60 = tpu.matmul %43, %5, %cst_29 {dimension_numbers = #tpu.dot_dimension_numbers<[1], [0], [0], [1], [0, 0, 1, 1], [], []>} : vector<32x8xf32>, vector<8x32xf32>, vector<32x32xf32> -> vector<32x32xf32>
    %cst_30 = arith.constant dense<0.000000e+00> : vector<32x32xf32>
    %61 = tpu.matmul %44, %5, %cst_30 {dimension_numbers = #tpu.dot_dimension_numbers<[1], [0], [0], [1], [0, 0, 1, 1], [], []>} : vector<32x8xf32>, vector<8x32xf32>, vector<32x32xf32> -> vector<32x32xf32>
    %62 = tpu.concatenate %60, %61, %59 in 1 : vector<32x32xf32>, vector<32x32xf32>, vector<32x8xf32> -> vector<32x72xf32>
    %c0_31 = arith.constant 0 : index
    %c0_32 = arith.constant 0 : index
    %63 = vector.load %arg9[%c0_31, %c0_32] : memref<72x32xf32, #tpu.memory_space<vmem>>, vector<72x32xf32>
    %cst_33 = arith.constant dense<0.000000e+00> : vector<32x32xf32>
    %64 = tpu.matmul %62, %63, %cst_33 {dimension_numbers = #tpu.dot_dimension_numbers<[1], [0], [0], [1], [0, 0, 1, 1], [], []>} : vector<32x72xf32>, vector<72x32xf32>, vector<32x32xf32> -> vector<32x32xf32>
    %c0_34 = arith.constant 0 : index
    %c0_35 = arith.constant 0 : index
    %65 = vector.load %arg10[%c0_34, %c0_35] : memref<1x32xf32, #tpu.memory_space<vmem>>, vector<1x32xf32>
    %66 = vector.broadcast %65 : vector<1x32xf32> to vector<32x32xf32>
    %67 = arith.addf %64, %66 : vector<32x32xf32>
    %68 = math.tanh %67 : vector<32x32xf32>
    %c0_36 = arith.constant 0 : index
    %c0_37 = arith.constant 0 : index
    %69 = vector.load %arg11[%c0_36, %c0_37] : memref<32x32xf32, #tpu.memory_space<vmem>>, vector<32x32xf32>
    %cst_38 = arith.constant dense<0.000000e+00> : vector<32x32xf32>
    %70 = tpu.matmul %68, %69, %cst_38 {dimension_numbers = #tpu.dot_dimension_numbers<[1], [0], [0], [1], [0, 0, 1, 1], [], []>} : vector<32x32xf32>, vector<32x32xf32>, vector<32x32xf32> -> vector<32x32xf32>
    %c0_39 = arith.constant 0 : index
    %c0_40 = arith.constant 0 : index
    %71 = vector.load %arg12[%c0_39, %c0_40] : memref<1x32xf32, #tpu.memory_space<vmem>>, vector<1x32xf32>
    %72 = vector.broadcast %71 : vector<1x32xf32> to vector<32x32xf32>
    %73 = arith.addf %70, %72 : vector<32x32xf32>
    %74 = vector.extract_strided_slice %73 {offsets = [0, 0], sizes = [16, 32], strides = [1, 1]} : vector<32x32xf32> to vector<16x32xf32>
    %75 = vector.extract_strided_slice %73 {offsets = [16, 0], sizes = [16, 32], strides = [1, 1]} : vector<32x32xf32> to vector<16x32xf32>
    %c0_41 = arith.constant 0 : index
    %c0_42 = arith.constant 0 : index
    %c0_43 = arith.constant 0 : index
    %76 = vector.load %arg13[%c0_41, %c0_42, %c0_43] : memref<2x96x64xf32, #tpu.memory_space<vmem>>, vector<1x96x64xf32>
    %77 = vector.shape_cast %76 : vector<1x96x64xf32> to vector<96x64xf32>
    %c0_44 = arith.constant 0 : index
    %c0_45 = arith.constant 0 : index
    %c0_46 = arith.constant 0 : index
    %78 = vector.load %arg14[%c0_44, %c0_45, %c0_46] : memref<2x1x64xf32, #tpu.memory_space<vmem>>, vector<1x1x64xf32>
    %79 = vector.shape_cast %78 : vector<1x1x64xf32> to vector<1x64xf32>
    %c0_47 = arith.constant 0 : index
    %c0_48 = arith.constant 0 : index
    %c0_49 = arith.constant 0 : index
    %80 = vector.load %arg15[%c0_47, %c0_48, %c0_49] : memref<2x96x64xf32, #tpu.memory_space<vmem>>, vector<1x96x64xf32>
    %81 = vector.shape_cast %80 : vector<1x96x64xf32> to vector<96x64xf32>
    %c0_50 = arith.constant 0 : index
    %c0_51 = arith.constant 0 : index
    %c0_52 = arith.constant 0 : index
    %82 = vector.load %arg16[%c0_50, %c0_51, %c0_52] : memref<2x1x64xf32, #tpu.memory_space<vmem>>, vector<1x1x64xf32>
    %83 = vector.shape_cast %82 : vector<1x1x64xf32> to vector<1x64xf32>
    %c0_53 = arith.constant 0 : index
    %c0_54 = arith.constant 0 : index
    %c0_55 = arith.constant 0 : index
    %84 = vector.load %arg17[%c0_53, %c0_54, %c0_55] : memref<2x1x32xf32, #tpu.memory_space<vmem>>, vector<1x1x32xf32>
    %85 = vector.shape_cast %84 : vector<1x1x32xf32> to vector<1x32xf32>
    %c0_56 = arith.constant 0 : index
    %c0_57 = arith.constant 0 : index
    %c0_58 = arith.constant 0 : index
    %86 = vector.load %arg18[%c0_56, %c0_57, %c0_58] : memref<2x1x32xf32, #tpu.memory_space<vmem>>, vector<1x1x32xf32>
    %87 = vector.shape_cast %86 : vector<1x1x32xf32> to vector<1x32xf32>
    %cst_59 = arith.constant dense<0.000000e+00> : vector<16x32xf32>
    %88 = tpu.matmul %14, %5, %cst_59 {dimension_numbers = #tpu.dot_dimension_numbers<[1], [0], [0], [1], [0, 0, 1, 1], [], []>} : vector<16x8xf32>, vector<8x32xf32>, vector<16x32xf32> -> vector<16x32xf32>
    %cst_60 = arith.constant dense<0.000000e+00> : vector<16x32xf32>
    %89 = tpu.matmul %21, %5, %cst_60 {dimension_numbers = #tpu.dot_dimension_numbers<[1], [0], [0], [1], [0, 0, 1, 1], [], []>} : vector<16x8xf32>, vector<8x32xf32>, vector<16x32xf32> -> vector<16x32xf32>
    %90 = tpu.concatenate %88, %89, %74 in 1 : vector<16x32xf32>, vector<16x32xf32>, vector<16x32xf32> -> vector<16x96xf32>
    %cst_61 = arith.constant dense<0.000000e+00> : vector<16x64xf32>
    %91 = tpu.matmul %90, %77, %cst_61 {dimension_numbers = #tpu.dot_dimension_numbers<[1], [0], [0], [1], [0, 0, 1, 1], [], []>} : vector<16x96xf32>, vector<96x64xf32>, vector<16x64xf32> -> vector<16x64xf32>
    %92 = vector.broadcast %79 : vector<1x64xf32> to vector<16x64xf32>
    %93 = arith.addf %91, %92 : vector<16x64xf32>
    %94 = vector.extract_strided_slice %93 {offsets = [0, 0], sizes = [16, 32], strides = [1, 1]} : vector<16x64xf32> to vector<16x32xf32>
    %cst_62 = arith.constant 5.000000e-01 : f32
    %95 = vector.broadcast %cst_62 : f32 to vector<16x32xf32>
    %96 = arith.mulf %95, %94 : vector<16x32xf32>
    %97 = math.tanh %96 : vector<16x32xf32>
    %cst_63 = arith.constant 1.000000e+00 : f32
    %98 = vector.broadcast %cst_63 : f32 to vector<16x32xf32>
    %99 = arith.addf %97, %98 : vector<16x32xf32>
    %cst_64 = arith.constant 5.000000e-01 : f32
    %100 = vector.broadcast %cst_64 : f32 to vector<16x32xf32>
    %101 = arith.mulf %100, %99 : vector<16x32xf32>
    %102 = vector.extract_strided_slice %93 {offsets = [0, 32], sizes = [16, 32], strides = [1, 1]} : vector<16x64xf32> to vector<16x32xf32>
    %cst_65 = arith.constant 0.000000e+00 : f32
    %103 = vector.broadcast %cst_65 : f32 to vector<16x32xf32>
    %104 = arith.maximumf %102, %103 : vector<16x32xf32>
    %105 = math.absf %102 : vector<16x32xf32>
    %cst_66 = arith.constant 0.000000e+00 : f32
    %106 = vector.broadcast %cst_66 : f32 to vector<16x32xf32>
    %107 = arith.subf %106, %105 : vector<16x32xf32>
    %108 = math.exp %107 : vector<16x32xf32>
    %109 = math.log1p %108 : vector<16x32xf32>
    %110 = arith.addf %104, %109 : vector<16x32xf32>
    %111 = arith.mulf %101, %110 : vector<16x32xf32>
    %cst_67 = arith.constant dense<0.000000e+00> : vector<16xf32>
    %112 = vector.multi_reduction <add>, %111, %cst_67 [1] : vector<16x32xf32> to vector<16xf32>
    %113 = vector.shape_cast %112 : vector<16xf32> to vector<16x1xf32>
    %cst_68 = arith.constant 3.200000e+01 : f32
    %114 = vector.broadcast %cst_68 : f32 to vector<16x1xf32>
    %115 = arith.divf %113, %114 : vector<16x1xf32>
    %116 = vector.broadcast %115 : vector<16x1xf32> to vector<16x32xf32>
    %117 = arith.subf %111, %116 : vector<16x32xf32>
    %118 = arith.mulf %117, %117 : vector<16x32xf32>
    %cst_69 = arith.constant dense<0.000000e+00> : vector<16xf32>
    %119 = vector.multi_reduction <add>, %118, %cst_69 [1] : vector<16x32xf32> to vector<16xf32>
    %120 = vector.shape_cast %119 : vector<16xf32> to vector<16x1xf32>
    %cst_70 = arith.constant 3.200000e+01 : f32
    %121 = vector.broadcast %cst_70 : f32 to vector<16x1xf32>
    %122 = arith.divf %120, %121 : vector<16x1xf32>
    %123 = vector.broadcast %115 : vector<16x1xf32> to vector<16x32xf32>
    %124 = arith.subf %111, %123 : vector<16x32xf32>
    %cst_71 = arith.constant 9.99999974E-6 : f32
    %125 = vector.broadcast %cst_71 : f32 to vector<16x1xf32>
    %126 = arith.addf %122, %125 : vector<16x1xf32>
    %127 = math.rsqrt %126 : vector<16x1xf32>
    %128 = vector.broadcast %127 : vector<16x1xf32> to vector<16x32xf32>
    %129 = arith.mulf %124, %128 : vector<16x32xf32>
    %130 = vector.broadcast %85 : vector<1x32xf32> to vector<16x32xf32>
    %131 = arith.mulf %129, %130 : vector<16x32xf32>
    %132 = vector.broadcast %87 : vector<1x32xf32> to vector<16x32xf32>
    %133 = arith.addf %131, %132 : vector<16x32xf32>
    %cst_72 = arith.constant dense<0.000000e+00> : vector<8x32xf32>
    %134 = tpu.matmul %42, %133, %cst_72 {dimension_numbers = #tpu.dot_dimension_numbers<[1], [0], [0], [1], [0, 0, 1, 1], [], []>} : vector<8x16xf32>, vector<16x32xf32>, vector<8x32xf32> -> vector<8x32xf32>
    %135 = arith.addf %5, %134 : vector<8x32xf32>
    %136 = tpu.concatenate %74, %75 in 0 : vector<16x32xf32>, vector<16x32xf32> -> vector<32x32xf32>
    %cst_73 = arith.constant dense<0.000000e+00> : vector<32x32xf32>
    %137 = tpu.matmul %43, %135, %cst_73 {dimension_numbers = #tpu.dot_dimension_numbers<[1], [0], [0], [1], [0, 0, 1, 1], [], []>} : vector<32x8xf32>, vector<8x32xf32>, vector<32x32xf32> -> vector<32x32xf32>
    %cst_74 = arith.constant dense<0.000000e+00> : vector<32x32xf32>
    %138 = tpu.matmul %44, %135, %cst_74 {dimension_numbers = #tpu.dot_dimension_numbers<[1], [0], [0], [1], [0, 0, 1, 1], [], []>} : vector<32x8xf32>, vector<8x32xf32>, vector<32x32xf32> -> vector<32x32xf32>
    %139 = tpu.concatenate %137, %136, %138 in 1 : vector<32x32xf32>, vector<32x32xf32>, vector<32x32xf32> -> vector<32x96xf32>
    %cst_75 = arith.constant dense<0.000000e+00> : vector<32x64xf32>
    %140 = tpu.matmul %139, %81, %cst_75 {dimension_numbers = #tpu.dot_dimension_numbers<[1], [0], [0], [1], [0, 0, 1, 1], [], []>} : vector<32x96xf32>, vector<96x64xf32>, vector<32x64xf32> -> vector<32x64xf32>
    %141 = vector.broadcast %83 : vector<1x64xf32> to vector<32x64xf32>
    %142 = arith.addf %140, %141 : vector<32x64xf32>
    %143 = vector.extract_strided_slice %142 {offsets = [0, 0], sizes = [32, 32], strides = [1, 1]} : vector<32x64xf32> to vector<32x32xf32>
    %cst_76 = arith.constant 5.000000e-01 : f32
    %144 = vector.broadcast %cst_76 : f32 to vector<32x32xf32>
    %145 = arith.mulf %144, %143 : vector<32x32xf32>
    %146 = math.tanh %145 : vector<32x32xf32>
    %cst_77 = arith.constant 1.000000e+00 : f32
    %147 = vector.broadcast %cst_77 : f32 to vector<32x32xf32>
    %148 = arith.addf %146, %147 : vector<32x32xf32>
    %cst_78 = arith.constant 5.000000e-01 : f32
    %149 = vector.broadcast %cst_78 : f32 to vector<32x32xf32>
    %150 = arith.mulf %149, %148 : vector<32x32xf32>
    %151 = vector.extract_strided_slice %142 {offsets = [0, 32], sizes = [32, 32], strides = [1, 1]} : vector<32x64xf32> to vector<32x32xf32>
    %cst_79 = arith.constant 0.000000e+00 : f32
    %152 = vector.broadcast %cst_79 : f32 to vector<32x32xf32>
    %153 = arith.maximumf %151, %152 : vector<32x32xf32>
    %154 = math.absf %151 : vector<32x32xf32>
    %cst_80 = arith.constant 0.000000e+00 : f32
    %155 = vector.broadcast %cst_80 : f32 to vector<32x32xf32>
    %156 = arith.subf %155, %154 : vector<32x32xf32>
    %157 = math.exp %156 : vector<32x32xf32>
    %158 = math.log1p %157 : vector<32x32xf32>
    %159 = arith.addf %153, %158 : vector<32x32xf32>
    %160 = arith.mulf %150, %159 : vector<32x32xf32>
    %161 = vector.extract_strided_slice %160 {offsets = [0, 0], sizes = [16, 32], strides = [1, 1]} : vector<32x32xf32> to vector<16x32xf32>
    %162 = vector.extract_strided_slice %160 {offsets = [16, 0], sizes = [16, 32], strides = [1, 1]} : vector<32x32xf32> to vector<16x32xf32>
    %c1 = arith.constant 1 : index
    %c0_81 = arith.constant 0 : index
    %c0_82 = arith.constant 0 : index
    %163 = vector.load %arg13[%c1, %c0_81, %c0_82] : memref<2x96x64xf32, #tpu.memory_space<vmem>>, vector<1x96x64xf32>
    %164 = vector.shape_cast %163 : vector<1x96x64xf32> to vector<96x64xf32>
    %c1_83 = arith.constant 1 : index
    %c0_84 = arith.constant 0 : index
    %c0_85 = arith.constant 0 : index
    %165 = vector.load %arg14[%c1_83, %c0_84, %c0_85] : memref<2x1x64xf32, #tpu.memory_space<vmem>>, vector<1x1x64xf32>
    %166 = vector.shape_cast %165 : vector<1x1x64xf32> to vector<1x64xf32>
    %c1_86 = arith.constant 1 : index
    %c0_87 = arith.constant 0 : index
    %c0_88 = arith.constant 0 : index
    %167 = vector.load %arg15[%c1_86, %c0_87, %c0_88] : memref<2x96x64xf32, #tpu.memory_space<vmem>>, vector<1x96x64xf32>
    %168 = vector.shape_cast %167 : vector<1x96x64xf32> to vector<96x64xf32>
    %c1_89 = arith.constant 1 : index
    %c0_90 = arith.constant 0 : index
    %c0_91 = arith.constant 0 : index
    %169 = vector.load %arg16[%c1_89, %c0_90, %c0_91] : memref<2x1x64xf32, #tpu.memory_space<vmem>>, vector<1x1x64xf32>
    %170 = vector.shape_cast %169 : vector<1x1x64xf32> to vector<1x64xf32>
    %c1_92 = arith.constant 1 : index
    %c0_93 = arith.constant 0 : index
    %c0_94 = arith.constant 0 : index
    %171 = vector.load %arg17[%c1_92, %c0_93, %c0_94] : memref<2x1x32xf32, #tpu.memory_space<vmem>>, vector<1x1x32xf32>
    %172 = vector.shape_cast %171 : vector<1x1x32xf32> to vector<1x32xf32>
    %c1_95 = arith.constant 1 : index
    %c0_96 = arith.constant 0 : index
    %c0_97 = arith.constant 0 : index
    %173 = vector.load %arg18[%c1_95, %c0_96, %c0_97] : memref<2x1x32xf32, #tpu.memory_space<vmem>>, vector<1x1x32xf32>
    %174 = vector.shape_cast %173 : vector<1x1x32xf32> to vector<1x32xf32>
    %cst_98 = arith.constant dense<0.000000e+00> : vector<16x32xf32>
    %175 = tpu.matmul %14, %135, %cst_98 {dimension_numbers = #tpu.dot_dimension_numbers<[1], [0], [0], [1], [0, 0, 1, 1], [], []>} : vector<16x8xf32>, vector<8x32xf32>, vector<16x32xf32> -> vector<16x32xf32>
    %cst_99 = arith.constant dense<0.000000e+00> : vector<16x32xf32>
    %176 = tpu.matmul %21, %135, %cst_99 {dimension_numbers = #tpu.dot_dimension_numbers<[1], [0], [0], [1], [0, 0, 1, 1], [], []>} : vector<16x8xf32>, vector<8x32xf32>, vector<16x32xf32> -> vector<16x32xf32>
    %177 = tpu.concatenate %175, %176, %161 in 1 : vector<16x32xf32>, vector<16x32xf32>, vector<16x32xf32> -> vector<16x96xf32>
    %cst_100 = arith.constant dense<0.000000e+00> : vector<16x64xf32>
    %178 = tpu.matmul %177, %164, %cst_100 {dimension_numbers = #tpu.dot_dimension_numbers<[1], [0], [0], [1], [0, 0, 1, 1], [], []>} : vector<16x96xf32>, vector<96x64xf32>, vector<16x64xf32> -> vector<16x64xf32>
    %179 = vector.broadcast %166 : vector<1x64xf32> to vector<16x64xf32>
    %180 = arith.addf %178, %179 : vector<16x64xf32>
    %181 = vector.extract_strided_slice %180 {offsets = [0, 0], sizes = [16, 32], strides = [1, 1]} : vector<16x64xf32> to vector<16x32xf32>
    %cst_101 = arith.constant 5.000000e-01 : f32
    %182 = vector.broadcast %cst_101 : f32 to vector<16x32xf32>
    %183 = arith.mulf %182, %181 : vector<16x32xf32>
    %184 = math.tanh %183 : vector<16x32xf32>
    %cst_102 = arith.constant 1.000000e+00 : f32
    %185 = vector.broadcast %cst_102 : f32 to vector<16x32xf32>
    %186 = arith.addf %184, %185 : vector<16x32xf32>
    %cst_103 = arith.constant 5.000000e-01 : f32
    %187 = vector.broadcast %cst_103 : f32 to vector<16x32xf32>
    %188 = arith.mulf %187, %186 : vector<16x32xf32>
    %189 = vector.extract_strided_slice %180 {offsets = [0, 32], sizes = [16, 32], strides = [1, 1]} : vector<16x64xf32> to vector<16x32xf32>
    %cst_104 = arith.constant 0.000000e+00 : f32
    %190 = vector.broadcast %cst_104 : f32 to vector<16x32xf32>
    %191 = arith.maximumf %189, %190 : vector<16x32xf32>
    %192 = math.absf %189 : vector<16x32xf32>
    %cst_105 = arith.constant 0.000000e+00 : f32
    %193 = vector.broadcast %cst_105 : f32 to vector<16x32xf32>
    %194 = arith.subf %193, %192 : vector<16x32xf32>
    %195 = math.exp %194 : vector<16x32xf32>
    %196 = math.log1p %195 : vector<16x32xf32>
    %197 = arith.addf %191, %196 : vector<16x32xf32>
    %198 = arith.mulf %188, %197 : vector<16x32xf32>
    %cst_106 = arith.constant dense<0.000000e+00> : vector<16xf32>
    %199 = vector.multi_reduction <add>, %198, %cst_106 [1] : vector<16x32xf32> to vector<16xf32>
    %200 = vector.shape_cast %199 : vector<16xf32> to vector<16x1xf32>
    %cst_107 = arith.constant 3.200000e+01 : f32
    %201 = vector.broadcast %cst_107 : f32 to vector<16x1xf32>
    %202 = arith.divf %200, %201 : vector<16x1xf32>
    %203 = vector.broadcast %202 : vector<16x1xf32> to vector<16x32xf32>
    %204 = arith.subf %198, %203 : vector<16x32xf32>
    %205 = arith.mulf %204, %204 : vector<16x32xf32>
    %cst_108 = arith.constant dense<0.000000e+00> : vector<16xf32>
    %206 = vector.multi_reduction <add>, %205, %cst_108 [1] : vector<16x32xf32> to vector<16xf32>
    %207 = vector.shape_cast %206 : vector<16xf32> to vector<16x1xf32>
    %cst_109 = arith.constant 3.200000e+01 : f32
    %208 = vector.broadcast %cst_109 : f32 to vector<16x1xf32>
    %209 = arith.divf %207, %208 : vector<16x1xf32>
    %210 = vector.broadcast %202 : vector<16x1xf32> to vector<16x32xf32>
    %211 = arith.subf %198, %210 : vector<16x32xf32>
    %cst_110 = arith.constant 9.99999974E-6 : f32
    %212 = vector.broadcast %cst_110 : f32 to vector<16x1xf32>
    %213 = arith.addf %209, %212 : vector<16x1xf32>
    %214 = math.rsqrt %213 : vector<16x1xf32>
    %215 = vector.broadcast %214 : vector<16x1xf32> to vector<16x32xf32>
    %216 = arith.mulf %211, %215 : vector<16x32xf32>
    %217 = vector.broadcast %172 : vector<1x32xf32> to vector<16x32xf32>
    %218 = arith.mulf %216, %217 : vector<16x32xf32>
    %219 = vector.broadcast %174 : vector<1x32xf32> to vector<16x32xf32>
    %220 = arith.addf %218, %219 : vector<16x32xf32>
    %cst_111 = arith.constant dense<0.000000e+00> : vector<8x32xf32>
    %221 = tpu.matmul %42, %220, %cst_111 {dimension_numbers = #tpu.dot_dimension_numbers<[1], [0], [0], [1], [0, 0, 1, 1], [], []>} : vector<8x16xf32>, vector<16x32xf32>, vector<8x32xf32> -> vector<8x32xf32>
    %222 = arith.addf %135, %221 : vector<8x32xf32>
    %223 = tpu.concatenate %161, %162 in 0 : vector<16x32xf32>, vector<16x32xf32> -> vector<32x32xf32>
    %cst_112 = arith.constant dense<0.000000e+00> : vector<32x32xf32>
    %224 = tpu.matmul %43, %222, %cst_112 {dimension_numbers = #tpu.dot_dimension_numbers<[1], [0], [0], [1], [0, 0, 1, 1], [], []>} : vector<32x8xf32>, vector<8x32xf32>, vector<32x32xf32> -> vector<32x32xf32>
    %cst_113 = arith.constant dense<0.000000e+00> : vector<32x32xf32>
    %225 = tpu.matmul %44, %222, %cst_113 {dimension_numbers = #tpu.dot_dimension_numbers<[1], [0], [0], [1], [0, 0, 1, 1], [], []>} : vector<32x8xf32>, vector<8x32xf32>, vector<32x32xf32> -> vector<32x32xf32>
    %226 = tpu.concatenate %224, %223, %225 in 1 : vector<32x32xf32>, vector<32x32xf32>, vector<32x32xf32> -> vector<32x96xf32>
    %cst_114 = arith.constant dense<0.000000e+00> : vector<32x64xf32>
    %227 = tpu.matmul %226, %168, %cst_114 {dimension_numbers = #tpu.dot_dimension_numbers<[1], [0], [0], [1], [0, 0, 1, 1], [], []>} : vector<32x96xf32>, vector<96x64xf32>, vector<32x64xf32> -> vector<32x64xf32>
    %228 = vector.broadcast %170 : vector<1x64xf32> to vector<32x64xf32>
    %229 = arith.addf %227, %228 : vector<32x64xf32>
    %230 = vector.extract_strided_slice %229 {offsets = [0, 0], sizes = [32, 32], strides = [1, 1]} : vector<32x64xf32> to vector<32x32xf32>
    %cst_115 = arith.constant 5.000000e-01 : f32
    %231 = vector.broadcast %cst_115 : f32 to vector<32x32xf32>
    %232 = arith.mulf %231, %230 : vector<32x32xf32>
    %233 = math.tanh %232 : vector<32x32xf32>
    %cst_116 = arith.constant 1.000000e+00 : f32
    %234 = vector.broadcast %cst_116 : f32 to vector<32x32xf32>
    %235 = arith.addf %233, %234 : vector<32x32xf32>
    %cst_117 = arith.constant 5.000000e-01 : f32
    %236 = vector.broadcast %cst_117 : f32 to vector<32x32xf32>
    %237 = arith.mulf %236, %235 : vector<32x32xf32>
    %238 = vector.extract_strided_slice %229 {offsets = [0, 32], sizes = [32, 32], strides = [1, 1]} : vector<32x64xf32> to vector<32x32xf32>
    %cst_118 = arith.constant 0.000000e+00 : f32
    %239 = vector.broadcast %cst_118 : f32 to vector<32x32xf32>
    %240 = arith.maximumf %238, %239 : vector<32x32xf32>
    %241 = math.absf %238 : vector<32x32xf32>
    %cst_119 = arith.constant 0.000000e+00 : f32
    %242 = vector.broadcast %cst_119 : f32 to vector<32x32xf32>
    %243 = arith.subf %242, %241 : vector<32x32xf32>
    %244 = math.exp %243 : vector<32x32xf32>
    %245 = math.log1p %244 : vector<32x32xf32>
    %246 = arith.addf %240, %245 : vector<32x32xf32>
    %247 = arith.mulf %237, %246 : vector<32x32xf32>
    %248 = vector.extract_strided_slice %247 {offsets = [16, 0], sizes = [16, 32], strides = [1, 1]} : vector<32x32xf32> to vector<16x32xf32>
    %c0_120 = arith.constant 0 : index
    %c0_121 = arith.constant 0 : index
    %249 = vector.load %arg19[%c0_120, %c0_121] : memref<8x32xf32, #tpu.memory_space<vmem>>, vector<8x32xf32>
    tpu.vector_store %arg19[%c0_120, %c0_121], %222 {strides = array<i32>} : memref<8x32xf32, #tpu.memory_space<vmem>>, vector<8x32xf32>,
    %c0_122 = arith.constant 0 : index
    %c0_123 = arith.constant 0 : index
    %250 = vector.load %arg20[%c0_122, %c0_123] : memref<16x32xf32, #tpu.memory_space<vmem>>, vector<16x32xf32>
    tpu.vector_store %arg20[%c0_122, %c0_123], %248 {strides = array<i32>} : memref<16x32xf32, #tpu.memory_space<vmem>>, vector<16x32xf32>,
    return
  }
}

</mosaic_0001>

<bundles_post_ra>
// kernel: mpnn_forward.1
= control target key start
LH: loop header
LB: loop body
LE: loop exit
PB: predicated region body
PF: predicated region fallthrough
CT: control target
= control target key end

     0   :  { %s4571_s0 = inlined_call_operand.vmem [shape: f32[8,4], index: 0, kind: input, shape index: {}]   ;;  %s4572_s1 = inlined_call_operand.vmem [shape: s32[16,2], index: 1, kind: input, shape index: {}]   ;;  %s4573_s2 = inlined_call_operand.vmem [shape: s32[1,16], index: 2, kind: input, shape index: {}]   ;;  %s4574_s3 = inlined_call_operand.vmem [shape: s32[16,2], index: 3, kind: input, shape index: {}]   ;;  %s4575_s4 = inlined_call_operand.vmem [shape: f32[16,1], index: 4, kind: input, shape index: {}]   ;;  %s4576_s5 = inlined_call_operand.vmem [shape: f32[16,1], index: 5, kind: input, shape index: {}]   ;;  %s4577_s6 = inlined_call_operand.vmem [shape: f32[4,32], index: 6, kind: input, shape index: {}]   ;;  %s4578_s7 = inlined_call_operand.vmem [shape: f32[1,32], index: 7, kind: input, shape index: {}]   ;;  %s4579_s8 = inlined_call_operand.vmem [shape: f32[1,8], index: 8, kind: input, shape index: {}]   ;;  %s4580_s9 = inlined_call_operand.vmem [shape: f32[72,32], index: 9, kind: input, shape index: {}]   ;;  %s4581_s10 = inlined_call_operand.vmem [shape: f32[1,32], index: 10, kind: input, shape index: {}]   ;;  %s4582_s11 = inlined_call_operand.vmem [shape: f32[32,32], index: 11, kind: input, shape index: {}]   ;;  %s4583_s12 = inlined_call_operand.vmem [shape: f32[1,32], index: 12, kind: input, shape index: {}]   ;;  %s4584_s13 = inlined_call_operand.vmem [shape: f32[2,96,64], index: 13, kind: input, shape index: {}]   ;;  %s4585_s14 = inlined_call_operand.vmem [shape: f32[2,1,64], index: 14, kind: input, shape index: {}]   ;;  %s4586_s15 = inlined_call_operand.vmem [shape: f32[2,96,64], index: 15, kind: input, shape index: {}]   ;;  %s4587_s16 = inlined_call_operand.vmem [shape: f32[2,1,64], index: 16, kind: input, shape index: {}]   ;;  %s4588_s17 = inlined_call_operand.vmem [shape: f32[2,1,32], index: 17, kind: input, shape index: {}]   ;;  %s4589_s18 = inlined_call_operand.vmem [shape: f32[2,1,32], index: 18, kind: input, shape index: {}]   ;;  %s4590_s19 = inlined_call_operand.hbm [shape: f32[8,32], index: 19, kind: output, shape index: {0}]   ;;  %s4591_s20 = inlined_call_operand.hbm [shape: f32[16,32], index: 20, kind: output, shape index: {1}]  }
   0x1   :  { %4595 = sst [smem:[#allocation8_spill]] %s4571_s0 }
   0x2   :  { %4596 = sst [smem:[#allocation9_spill]] %s4572_s1 }
   0x3   :  { %4597 = sst [smem:[#allocation10_spill]] %s4573_s2 }
   0x4   :  { %4598 = sst [smem:[#allocation11_spill]] %s4574_s3 }
   0x5   :  { %4599 = sst [smem:[#allocation12_spill]] %s4575_s4 }
   0x6   :  { %26 = vsyncpa [#allocation3], 0  ;;  %v67_v0 = vld [vmem:[%s4577_s6] sm:$0xf]  ;;  %vm79_vm0 = vcmask 1043456   ;;  %s4600_s2 = sld [smem:[#allocation8_spill]] }
   0x7   :  { %v3653_v2 = vmov 0.0   ;;  %vm3654_vm1 = vmmov 0   ;;  %vm75_vm2 = vcmask 31744   ;;  %s4601_s26 = sld [smem:[#allocation9_spill]]  ;;  %s4602_s6 = sld [smem:[#allocation12_spill]]  ;;  %v3655_v5 = vmov 1  }
   0x8   :  { %3099 = vmatprep.subr.mxu1 %v3653_v2  ;;  %3101 = vmatprep.mubr.msk.f32.mxu1 %vm3654_vm1, %v3653_v2  ;;  %v3656_v7 = vmov 0  }
   0x9   :  { %3100 = vmatpush3.msk.msra.mxu1 %vm79_vm0, %v67_v0  ;;  %3498 = vset.pattern.permute.xlu0 %v3655_v5 }
   0xa   :  { %3499 = vset.pattern.permute.xlu1 %v3656_v7 }
   0xc   :  { %v66_v1 = vld [vmem:[%s4600_s2] sm:$0xff] }
   0xd   :  { %v153_v3 = vld [vmem:[%s4601_s26] sm:$0xff]  ;;  %v209_v4 = vld [vmem:[%s4602_s6 + $0x8] sm:$0xff]  ;;  %3102 = vmatmul.mubr.msk.f32.vlgmr.msra.gmra.mrb[0].mxu1 %vm75_vm2, %v66_v1 }
   0xe   :  { %v208_v6 = vld [vmem:[%s4602_s6] sm:$0xff] }
   0xf   :  { %3505 = vrcp.f32 %v208_v6 }
  0x10   :  { %27 = vsyncpa [#allocation5], 0  ;;  %160 = vperm.xlu1 %3499, %v153_v3   ;;  %170 = vperm.xlu0 %3498, %v153_v3   ;;  %3507 = vrcp.f32 %v209_v4  ;;  %v154_v8 = vld [vmem:[%s4601_s26 + $0x8] sm:$0xff]  ;;  %s4603_s22 = sld [smem:[#allocation11_spill]]  ;;  %v157_v13 = vlaneseq  ;;  %v216_v18 = vld [vmem:[%s4579_s8] sm:$0x1] }
  0x11   :  { %vm692_vm3 = vcmask 64512   ;;  %v217_v21 = vmul.f32 0.2, %v216_v18  ;;  %v3657_v38 = vmov 683565275   ;;  %s3665_s26 = smov 96  }
  0x12   :  { %v3803_v14 = vand.u32 127, %v157_v13  ;;  %v3805_v15 = vshrl.u32 %v157_v13, 7  ;;  %v3658_v40 = vmov 2475754826   ;;  %v3659_v42 = vmov 2131351028  }
  0x13   :  { %v3660_v44 = vmov 2102212464   ;;  %v3661_v46 = vmov 920167782   ;;  %v3662_v53 = vmov 1326507024  }
  0x14   :  { %163 = vperm.xlu1 %3499, %v154_v8   ;;  %173 = vperm.xlu0 %3498, %v154_v8   ;;  %v241_v22 = vsub.s32 0, %v3805_v15  ;;  %s4604_s0 = sld [smem:[#allocation10_spill]] }
  0x16   :  { %v155_v11 = vld [vmem:[%s4603_s22] sm:$0xff]  ;;  %v156_v12 = vld [vmem:[%s4603_s22 + $0x8] sm:$0xff]  ;;  %v3825_v24 = vrot.slane %v217_v21, %v241_v22 }
  0x18   :  { %225 = vperm.xlu1 %3499, %v209_v4   ;;  %3500 = vset.pattern.permute.xlu0 %v3656_v7 }
  0x19   :  { %v3506_v9 = vpop.eup %3505  ;;  %220 = vperm.xlu0 %3500, %v208_v6  }
  0x1a   :  { %v3508_v10 = vpop.eup %3507 }
  0x1c   :  { %670 = vperm.xlu1 %3499, %v3506_v9  }
  0x1d   :  { %675 = vperm.xlu0 %3500, %v3508_v10  }
  0x20   :  { %3501 = vset.pattern.permute.xlu1 %v3655_v5 }
  0x21   :  { %190 = vperm.xlu1 %3501, %v155_v11   ;;  %3502 = vset.pattern.permute.xlu0 %v3655_v5 }
  0x22   :  { %193 = vperm.xlu0 %3502, %v156_v12  }
  0x25   :  { %3503 = vset.pattern.permute.xlu1 %v3656_v7 }
  0x26   :  { %180 = vperm.xlu1 %3503, %v155_v11   ;;  %3504 = vset.pattern.permute.xlu0 %v3656_v7 }
  0x2a   :  { %183 = vperm.xlu1 %3503, %v156_v12  }
  0x8f   :  { %v161_v16 = vpop.permute.xlu1 %160  ;;  %v171_v17 = vpop.permute.xlu0 %170 }
  0x90   :  { %vm165_vm4 = vcmp.eq.s32.totalorder %v161_v16, %v3803_v14  ;;  %vm175_vm5 = vcmp.eq.s32.totalorder %v171_v17, %v3803_v14 }
  0x91   :  { %v3813_v19 = vsel %vm165_vm4, 1.0, %v3653_v2  ;;  %v3816_v20 = vsel %vm175_vm5, 1.0, %v3653_v2 }
  0x92   :  { %3114 = vmatprep.mubr.msk.f32.mxu0 %vm692_vm3, %v3816_v20  ;;  %3106 = vmatprep.mubr.msk.f32.mxu1 %vm692_vm3, %v3813_v19 }
  0x93   :  { %v3823_v23 = vpop.permute.xlu1 %163 }
  0x94   :  { %vm166_vm2 = vcmp.eq.s32.totalorder %v3823_v23, %v3803_v14 }
  0x97   :  { %v226_v25 = vpop.permute.xlu1 %225 }
  0x98   :  { %v3828_v26 = vmul.f32 %v3825_v24, %v226_v25 }
  0x9a   :  { %v355_v27 = vand.u32 2139095040, %v3828_v26  ;;  %v352_v29 = vand.u32 2147483647, %v3828_v26  ;;  %vm354_vm13 = vcmp.lt.s32.totalorder %v3828_v26, 0 }
  0x9c   :  { %v356_v28 = vshrl.u32 %v355_v27, 23  ;;  %v359_v32 = vand.u32 8388607, %v352_v29  ;;  %vm353_vm14 = vcmp.le.f32.partialorder %v352_v29, 0.7853982 }
  0x9e   :  { %v2864_v30 = vadd.s32 4294967169, %v356_v28  ;;  %v360_v35 = vor.u32 8388608, %v359_v32 }
  0xa0   :  { %v362_v31 = vadd.s32 1, %v2864_v30  ;;  %v400_v55 = vshll.u32 %v360_v35, 8 }
  0xa2   :  { %vm363_vm6 = vcmp.gt.s32.totalorder %v362_v31, 0 }
  0xa3   :  { %v364_v33 = vsel %vm363_vm6, %v362_v31, 0 }
  0xa4   :  { %v366_v34 = vand.u32 31, %v364_v33  ;;  %v365_v36 = vshrl.u32 %v364_v33, 5 }
  0xa6   :  { %v367_v37 = vsub.s32 32, %v366_v34  ;;  %v369_v39 = vshll.u32 %v3657_v38, %v366_v34  ;;  %v372_v41 = vshll.u32 %v3658_v40, %v366_v34  ;;  %v375_v43 = vshll.u32 %v3659_v42, %v366_v34 }
  0xa7   :  { %v378_v45 = vshll.u32 %v3660_v44, %v366_v34  ;;  %v381_v47 = vshll.u32 %v3661_v46, %v366_v34  ;;  %vm384_vm7 = vcmp.lt.s32.totalorder %v365_v36, 1  ;;  %vm387_vm8 = vcmp.lt.s32.totalorder %v365_v36, 4 }
  0xa8   :  { %v368_v48 = vshrl.u32 %v3657_v38, %v367_v37  ;;  %v370_v49 = vshrl.u32 %v3658_v40, %v367_v37  ;;  %v373_v50 = vshrl.u32 %v3659_v42, %v367_v37  ;;  %v376_v51 = vshrl.u32 %v3660_v44, %v367_v37 }
  0xa9   :  { %v379_v52 = vshrl.u32 %v3661_v46, %v367_v37  ;;  %v382_v54 = vshrl.u32 %v3662_v53, %v367_v37  ;;  %vm385_vm9 = vcmp.lt.s32.totalorder %v365_v36, 2  ;;  %vm386_vm10 = vcmp.lt.s32.totalorder %v365_v36, 3 }
  0xaa   :  { %v371_v56 = vor.u32 %v370_v49, %v369_v39  ;;  %v374_v57 = vor.u32 %v373_v50, %v372_v41  ;;  %v377_v58 = vor.u32 %v376_v51, %v375_v43 }
  0xab   :  { %v380_v59 = vor.u32 %v379_v52, %v378_v45  ;;  %v383_v60 = vor.u32 %v382_v54, %v381_v47 }
  0xac   :  { %v388_v61 = vsel %vm384_vm7, %v368_v48, %v371_v56  ;;  %v389_v62 = vsel %vm387_vm8, %v377_v58, 2102212464  ;;  %v392_v63 = vsel %vm384_vm7, %v371_v56, %v374_v57  ;;  %v396_v0 = vsel %vm384_vm7, %v374_v57, %v377_v58  ;;  %v174_v48 = vpop.permute.xlu0 %173 }
  0xad   :  { %v390_v1 = vsel %vm386_vm10, %v374_v57, %v389_v62  ;;  %v393_v3 = vsel %vm387_vm8, %v380_v59, 920167782  ;;  %v397_v4 = vsel %vm387_vm8, %v383_v60, 1326507024  ;;  %vm176_vm0 = vcmp.eq.s32.totalorder %v174_v48, %v3803_v14 }
  0xae   :  { %v394_v5 = vsel %vm386_vm10, %v377_v58, %v393_v3  ;;  %v398_v6 = vsel %vm386_vm10, %v380_v59, %v397_v4  ;;  %v391_v7 = vsel %vm385_vm9, %v388_v61, %v390_v1  ;;  %v3858_v59 = vpop.permute.xlu1 %670  ;;  %v2856_v1 = vld [vmem:[%s4578_s7] ss:$0 sm:$0xff]  ;;  %vm444_vm8 = vweird.f32 %v3828_v26 }
  0xaf   :  { %v395_v8 = vsel %vm385_vm9, %v392_v63, %v394_v5  ;;  %v399_v9 = vsel %vm385_vm9, %v396_v0, %v398_v6  ;;  %v407_v16 = vmul.u32 %v400_v55, %v391_v7 }
  0xb0   :  { %v3845_v10 = vmul.u32.u64.low %v400_v55, %v399_v9  ;;  %v3846_v11 = vmul.u32.u64.high %v400_v55, %v399_v9, %v3845_v10  ;;  %v3848_v12 = vmul.u32.u64.low %v400_v55, %v395_v8  ;;  %v3849_v13 = vmul.u32.u64.high %v400_v55, %v395_v8, %v3848_v12  ;;  %v221_v55 = vpop.permute.xlu0 %220 }
  0xb1   :  { %v3879_v10 = vsel %vm176_vm0, 1.0, %v3653_v2 }
  0xb2   :  { %vm409_vm11 = vc.u32 %v3846_v11, %v3848_v12  ;;  %v410_v17 = vadd.s32 1, %v3849_v13  ;;  %v408_v34 = vadd.s32 %v3848_v12, %v3846_v11  ;;  %v191_v0 = vpop.permute.xlu1 %190 }
  0xb3   :  { %vm195_vm15 = vcmp.eq.s32.totalorder %v191_v0, %v3803_v14 }
  0xb4   :  { %v411_v18 = vsel %vm409_vm11, %v410_v17, %v3849_v13  ;;  %v3861_v62 = vpop.permute.xlu0 %675  ;;  %v3875_v8 = vsel %vm195_vm15, 1.0, %v3653_v2  ;;  %v3890_v13 = vsel %vm166_vm2, 1.0, %v3653_v2 }
  0xb5   :  { %v412_v21 = vadd.s32 %v411_v18, %v407_v16 }
  0xb7   :  { %v413_v22 = vadd.s32 536870912, %v412_v21 }
  0xb8   :  { %v194_v29 = vpop.permute.xlu0 %193 }
  0xb9   :  { %v414_v25 = vshrl.u32 %v413_v22, 30  ;;  %vm196_vm5 = vcmp.eq.s32.totalorder %v194_v29, %v3803_v14 }
  0xba   :  { %v3895_v17 = vsel %vm196_vm5, 1.0, %v3653_v2 }
  0xbb   :  { %v415_v27 = vshll.u32 %v414_v25, 30  ;;  %v438_v52 = vsub.s32 4, %v414_v25 }
  0xbd   :  { %v416_v28 = vsub.s32 %v412_v21, %v415_v27  ;;  %v439_v57 = vsel %vm354_vm13, %v438_v52, %v414_v25 }
  0xbe   :  { %v441_v61 = vsel %vm353_vm14, 0, %v439_v57 }
  0xbf   :  { %v418_v30 = vsub.s32 0, %v416_v28  ;;  %v445_v63 = vadd.s32 3, %v441_v61 }
  0xc1   :  { %v2865_v31 = vmin.u32 %v418_v30, %v416_v28  ;;  %v446_v3 = vand.u32 3, %v445_v63 }
  0xc3   :  { %v420_v32 = vclz %v2865_v31  ;;  %vm451_vm4 = vcmp.eq.s32.totalorder %v446_v3, 2  ;;  %vm448_vm6 = vcmp.eq.s32.totalorder %v446_v3, 0  ;;  %vm447_vm7 = vcmp.lt.s32.totalorder %v446_v3, 2 }
  0xc5   :  { %v2866_v33 = vadd.s32 4294967294, %v420_v32 }
  0xc7   :  { %vm2867_vm12 = vcmp.lt.s32.totalorder %v2866_v33, 0 }
  0xc8   :  { %v423_v35 = vsel %vm2867_vm12, 0, %v2866_v33 }
  0xc9   :  { %v424_v36 = vsub.s32 32, %v423_v35  ;;  %v425_v37 = vshll.u32 %v416_v28, %v423_v35  ;;  %v428_v39 = vsub.s32 4294967266, %v423_v35 }
  0xcb   :  { %v426_v41 = vshrl.u32 %v408_v34, %v424_v36  ;;  %v429_v43 = vadd.s32 127, %v428_v39 }
  0xcd   :  { %v427_v45 = vor.u32 %v426_v41, %v425_v37  ;;  %v430_v47 = vshll.u32 %v429_v43, 23 }
  0xcf   :  { %v431_v49 = vor.u32 4788187, %v430_v47  ;;  %v434_v50 = vcvt.s32.f32 %v427_v45 }
  0xd1   :  { %v432_v51 = vand.u32 2147483647, %v431_v49 }
  0xd3   :  { %v435_v54 = vmul.f32 %v434_v50, %v432_v51 }
  0xd5   :  { %v436_v56 = vxor.u32 2147483648, %v435_v54 }
  0xd7   :  { %v437_v58 = vsel %vm354_vm13, %v436_v56, %v435_v54 }
  0xd8   :  { %v440_v60 = vsel %vm353_vm14, %v3828_v26, %v437_v58  ;;  %v3919_v26 = vmul.f32 %v3825_v24, %v221_v55 }
  0xd9   :  { %3509 = vcosq.f32 %v440_v60 }
  0xda   :  { %3511 = vsinq.f32 %v440_v60  ;;  %v251_v22 = vand.u32 2139095040, %v3919_v26  ;;  %v248_v35 = vand.u32 2147483647, %v3919_v26 }
  0xdc   :  { %v252_v25 = vshrl.u32 %v251_v22, 23  ;;  %v255_v51 = vand.u32 8388607, %v248_v35  ;;  %v930_v22 = vld [vmem:[%s4580_s9 + $0x8] sm:$0xff]  ;;  %vm249_vm5 = vcmp.le.f32.partialorder %v248_v35, 0.7853982 }
  0xdd   :  { %v936_v35 = vld [vmem:[%s4580_s9 + $0x38] sm:$0xff] }
  0xde   :  { %v2860_v27 = vadd.s32 4294967169, %v252_v25  ;;  %v256_v58 = vor.u32 8388608, %v255_v51  ;;  %v931_v25 = vld [vmem:[%s4580_s9 + $0x10] sm:$0xff] }
  0xe0   :  { %v149_v4 = vpop.f32.mrb[0].mxu1  ;;  %v258_v28 = vadd.s32 1, %v2860_v27  ;;  %v296_v3 = vshll.u32 %v256_v58, 8 }
  0xe1   :  { %v3868_v5 = vadd.f32 %v2856_v1, %v149_v4  ;;  %v3103_v6 = vpop.f32.mrb[1].mxu1 }
  0xe2   :  { %vm259_vm9 = vcmp.gt.s32.totalorder %v258_v28, 0 }
  0xe3   :  { %v3510_v7 = vpop.eup %3509  ;;  %3104 = vmatprep.subr.mxu1 %v3868_v5  ;;  %3112 = vmatprep.subr.mxu0 %v3868_v5  ;;  %v260_v30 = vsel %vm259_vm9, %v258_v28, 0  ;;  %vm340_vm9 = vweird.f32 %v3919_v26 }
  0xe4   :  { %v3512_v9 = vpop.eup %3511  ;;  %v452_v11 = vxor.u32 2147483648, %v3510_v7  ;;  %3105 = vmatpush3.msra.mxu1 %v3868_v5  ;;  %3113 = vmatpush3.msra.mxu0 %v3868_v5  ;;  %v262_v31 = vand.u32 31, %v260_v30  ;;  %v261_v36 = vshrl.u32 %v260_v30, 5 }
  0xe5   :  { %v449_v12 = vxor.u32 2147483648, %v3512_v9  ;;  %3115 = vmatmul.mubr.msk.f32.vlgmr.msra.gmra.mrb[0].mxu0 %vm692_vm3, %v3879_v10  ;;  %3158 = vmatprep.subr.mxu0 %v3868_v5 }
  0xe6   :  { %v453_v16 = vsel %vm451_vm4, %v452_v11, %v3512_v9  ;;  %3159 = vmatpush3.msra.mxu0 %v3868_v5  ;;  %3117 = vmatprep.mubr.msk.f32.mxu0 %vm692_vm3, %v3875_v8  ;;  %v263_v32 = vsub.s32 32, %v262_v31  ;;  %v274_v33 = vshll.u32 %v3660_v44, %v262_v31  ;;  %v277_v37 = vshll.u32 %v3661_v46, %v262_v31 }
  0xe7   :  { %v450_v18 = vsel %vm448_vm6, %v3510_v7, %v449_v12  ;;  %3163 = vmatprep.subr.mxu0 %v3868_v5  ;;  %3107 = vmatmul.mubr.msk.f32.vlgmr.msra.gmra.mrb[2].mxu1 %vm692_vm3, %v3890_v13  ;;  %v265_v41 = vshll.u32 %v3657_v38, %v262_v31  ;;  %v268_v43 = vshll.u32 %v3658_v40, %v262_v31  ;;  %vm283_vm10 = vcmp.lt.s32.totalorder %v261_v36, 4 }
  0xe8   :  { %v454_v23 = vsel %vm447_vm7, %v450_v18, %v453_v16  ;;  %v275_v34 = vshrl.u32 %v3661_v46, %v263_v32  ;;  %v278_v39 = vshrl.u32 %v3662_v53, %v263_v32  ;;  %v266_v45 = vshrl.u32 %v3658_v40, %v263_v32  ;;  %v181_v18 = vpop.permute.xlu1 %180 }
  0xe9   :  { %v3903_v21 = vsel %vm444_vm8, nan, %v454_v23  ;;  %3118 = vmatmul.mubr.msk.f32.gmra.mrb[2].mxu0 %vm692_vm3, %v3895_v17  ;;  %v269_v47 = vshrl.u32 %v3659_v42, %v263_v32  ;;  %v271_v48 = vshll.u32 %v3659_v42, %v262_v31  ;;  %v272_v49 = vshrl.u32 %v3660_v44, %v263_v32  ;;  %v929_v23 = vld [vmem:[%s4580_s9] sm:$0xff]  ;;  %v932_v31 = vld [vmem:[%s4580_s9 + $0x18] sm:$0xff] }
  0xea   :  { %3160 = vmatprep.mubr.msk.f32.mxu0 %vm692_vm3, %v3813_v19  ;;  %v276_v50 = vor.u32 %v275_v34, %v274_v33  ;;  %v279_v52 = vor.u32 %v278_v39, %v277_v37  ;;  %v267_v54 = vor.u32 %v266_v45, %v265_v41  ;;  %vm280_vm11 = vcmp.lt.s32.totalorder %v261_v36, 1  ;;  %v933_v34 = vld [vmem:[%s4580_s9 + $0x20] sm:$0xff]  ;;  %v934_v37 = vld [vmem:[%s4580_s9 + $0x28] sm:$0xff] }
  0xeb   :  { %v270_v55 = vor.u32 %v269_v47, %v268_v43  ;;  %v273_v56 = vor.u32 %v272_v49, %v271_v48  ;;  %vm282_vm12 = vcmp.lt.s32.totalorder %v261_v36, 3  ;;  %vm281_vm13 = vcmp.lt.s32.totalorder %v261_v36, 2 }
  0xec   :  { %v289_v57 = vsel %vm283_vm10, %v276_v50, 920167782  ;;  %v293_v60 = vsel %vm283_vm10, %v279_v52, 1326507024  ;;  %v264_v9 = vshrl.u32 %v3657_v38, %v263_v32  ;;  %vm185_vm14 = vcmp.eq.s32.totalorder %v181_v18, %v3803_v14  ;;  %v184_v43 = vpop.permute.xlu1 %183 }
  0xed   :  { %3161 = vmatmul.mubr.msk.f32.vlgmr.msra.gmra.mrb[4].mxu0 %vm692_vm3, %v3890_v13  ;;  %v288_v61 = vsel %vm280_vm11, %v267_v54, %v270_v55  ;;  %v290_v63 = vsel %vm282_vm12, %v273_v56, %v289_v57  ;;  %v292_v0 = vsel %vm280_vm11, %v270_v55, %v273_v56  ;;  %v294_v1 = vsel %vm282_vm12, %v276_v50, %v293_v60 }
  0xee   :  { %3164 = vmatpush3.msra.mxu0 %v3868_v5  ;;  %3165 = vmatprep.mubr.msk.f32.mxu0 %vm692_vm3, %v3816_v20  ;;  %v291_v4 = vsel %vm281_vm13, %v288_v61, %v290_v63  ;;  %v295_v29 = vsel %vm281_vm13, %v292_v0, %v294_v1  ;;  %v285_v16 = vsel %vm283_vm10, %v273_v56, 2102212464  ;;  %v284_v27 = vsel %vm280_vm11, %v264_v9, %v267_v54 }
  0xef   :  { %v3943_v6 = vmul.u32.u64.low %v296_v3, %v291_v4  ;;  %v3944_v7 = vmul.u32.u64.high %v296_v3, %v291_v4, %v3943_v6  ;;  %v3947_v11 = vmul.u32.u64.low %v296_v3, %v295_v29  ;;  %v3948_v12 = vmul.u32.u64.high %v296_v3, %v295_v29, %v3947_v11 }
  0xf0   :  { %v286_v28 = vsel %vm282_vm12, %v270_v55, %v285_v16  ;;  %v3338_v30 = vpack.c.bf16 %v930_v22, %v929_v23  ;;  %v3967_v32 = vsel %vm185_vm14, 1.0, %v3653_v2  ;;  %v3342_v33 = vpack.c.bf16 %v932_v31, %v931_v25 }
  0xf1   :  { %3166 = vmatmul.mubr.msk.f32.vlgmr.msra.gmra.mrb[6].mxu0 %vm692_vm3, %v3879_v10  ;;  %3109 = vmatprep.mubr.msk.f32.mxu1 %vm692_vm3, %v3967_v32  ;;  %v287_v39 = vsel %vm281_vm13, %v284_v27, %v286_v28  ;;  %v306_v41 = vadd.s32 1, %v3944_v7  ;;  %vm305_vm15 = vc.u32 %v3948_v12, %v3943_v6  ;;  %vm186_vm0 = vcmp.eq.s32.totalorder %v184_v43, %v3803_v14 }
  0xf2   :  { %3199 = vmatprep.mubr.msk.f32.mxu0 %vm3654_vm1, %v3653_v2  ;;  %3339 = vmatprep.subr.bf16.mxu1 %v3338_v30  ;;  %v3346_v45 = vpack.c.bf16 %v934_v37, %v933_v34  ;;  %v3982_v47 = vsel %vm186_vm0, 1.0, %v3653_v2  ;;  %v303_v48 = vmul.u32 %v296_v3, %v287_v39  ;;  %v304_v61 = vadd.s32 %v3943_v6, %v3948_v12  ;;  %v935_v37 = vld [vmem:[%s4580_s9 + $0x30] sm:$0xff] }
  0xf3   :  { %3341 = vmatpush3.bf16.msra.mxu1 %v3338_v30  ;;  %v307_v36 = vsel %vm305_vm15, %v306_v41, %v3944_v7  ;;  %vm250_vm4 = vcmp.lt.s32.totalorder %v3919_v26, 0  ;;  %v3350_v39 = vpack.c.bf16 %v936_v35, %v935_v37  ;;  %vm919_vm10 = vcmask 261120  }
  0xf4   :  { %3343 = vmatprep.subr.bf16.mxu1 %v3342_v33  ;;  %3110 = vmatmul.mubr.msk.f32.gmra.mrb[4].mxu1 %vm692_vm3, %v3982_v47  ;;  %v308_v49 = vadd.s32 %v307_v36, %v303_v48  ;;  %vm924_vm11 = vcmask 523264   ;;  %vm945_vm12 = vcmask 588800  }
  0xf6   :  { %v309_v50 = vadd.s32 536870912, %v308_v49 }
  0xf7   :  { %3345 = vmatpush3.bf16.msra.mxu1 %v3342_v33 }
  0xf8   :  { %3347 = vmatprep.subr.bf16.mxu1 %v3346_v45  ;;  %v310_v51 = vshrl.u32 %v309_v50, 30  ;;  %v211_v50 = vld [vmem:[%s4576_s5 + $0x8] sm:$0xff] }
  0xfa   :  { %v311_v52 = vshll.u32 %v310_v51, 30  ;;  %v334_v22 = vsub.s32 4, %v310_v51 }
  0xfb   :  { %3349 = vmatpush3.bf16.msra.mxu1 %v3346_v45  ;;  %v937_v45 = vld [vmem:[%s4580_s9 + $0x40] sm:$0xff]  ;;  %s3663_s9 = smov 32  }
  0xfc   :  { %v312_v54 = vsub.s32 %v308_v49, %v311_v52  ;;  %v335_v12 = vsel %vm250_vm4, %v334_v22, %v310_v51  ;;  %3351 = vmatprep.subr.bf16.mxu1 %v3350_v39  ;;  %v210_v49 = vld [vmem:[%s4576_s5] sm:$0xff]  ;;  %v665_v51 = vmul.f32 0.4, %v3903_v21  ;;  %s3664_s5 = smov 64  }
  0xfd   :  { %v337_v25 = vsel %vm249_vm5, 0, %v335_v12 }
  0xfe   :  { %v314_v14 = vsub.s32 0, %v312_v54  ;;  %v341_v27 = vadd.s32 3, %v337_v25 }
  0xff   :  { %3353 = vmatpush3.bf16.msra.mxu1 %v3350_v39 }
 0x100   :  { %v2861_v55 = vmin.u32 %v314_v14, %v312_v54  ;;  %v342_v31 = vand.u32 3, %v341_v27  ;;  %3136 = vmatprep.subr.mxu1 %v937_v45 }
 0x102   :  { %v316_v56 = vclz %v2861_v55  ;;  %vm344_vm6 = vcmp.eq.s32.totalorder %v342_v31, 0  ;;  %vm347_vm7 = vcmp.eq.s32.totalorder %v342_v31, 2  ;;  %vm343_vm8 = vcmp.lt.s32.totalorder %v342_v31, 2 }
 0x103   :  { %3137 = vmatpush3.msra.mxu1 %v937_v45  ;;  %v689_v55 = vmul.f32 %v3861_v62, %v665_v51 }
 0x104   :  { %v2862_v57 = vadd.s32 4294967294, %v316_v56 }
 0x106   :  { %vm2863_vm2 = vcmp.lt.s32.totalorder %v2862_v57, 0 }
 0x107   :  { %v319_v58 = vsel %vm2863_vm2, 0, %v2862_v57 }
 0x108   :  { %v324_v60 = vsub.s32 4294967266, %v319_v58  ;;  %v320_v63 = vsub.s32 32, %v319_v58  ;;  %v321_v1 = vshll.u32 %v312_v54, %v319_v58 }
 0x10a   :  { %v325_v0 = vadd.s32 127, %v324_v60  ;;  %v322_v3 = vshrl.u32 %v304_v61, %v320_v63 }
 0x10c   :  { %v326_v4 = vshll.u32 %v325_v0, 23  ;;  %v323_v29 = vor.u32 %v322_v3, %v321_v1 }
 0x10e   :  { %v327_v7 = vor.u32 4788187, %v326_v4  ;;  %v330_v11 = vcvt.s32.f32 %v323_v29 }
 0x110   :  { %v328_v9 = vand.u32 2147483647, %v327_v7 }
 0x112   :  { %v331_v16 = vmul.f32 %v330_v11, %v328_v9 }
 0x114   :  { %v332_v18 = vxor.u32 2147483648, %v331_v16 }
 0x116   :  { %v333_v23 = vsel %vm250_vm4, %v332_v18, %v331_v16 }
 0x117   :  { %v336_v6 = vsel %vm249_vm5, %v3919_v26, %v333_v23 }
 0x118   :  { %3513 = vcosq.f32 %v336_v6 }
 0x119   :  { %3515 = vsinq.f32 %v336_v6 }
 0x11a   :  { %3517 = vrcp.f32 %v210_v49 }
 0x11b   :  { %3519 = vrcp.f32 %v211_v50 }
 0x122   :  { %v3514_v28 = vpop.eup %3513 }
 0x123   :  { %v3516_v30 = vpop.eup %3515  ;;  %v348_v34 = vxor.u32 2147483648, %v3514_v28 }
 0x124   :  { %v345_v33 = vxor.u32 2147483648, %v3516_v30  ;;  %v3518_v63 = vpop.eup %3517 }
 0x125   :  { %v349_v43 = vsel %vm347_vm7, %v348_v34, %v3516_v30  ;;  %v3520_v0 = vpop.eup %3519 }
 0x126   :  { %v346_v41 = vsel %vm344_vm6, %v3514_v28, %v345_v33 }
 0x127   :  { %v350_v48 = vsel %vm343_vm8, %v346_v41, %v349_v43 }
 0x128   :  { %v351_v36 = vsel %vm340_vm9, nan, %v350_v48 }
 0x129   :  { %v664_v52 = vmul.f32 0.4, %v351_v36 }
 0x12b   :  { %v688_v57 = vmul.f32 %v3858_v59, %v664_v52 }
 0x1b8   :  { %v3116_v54 = vpop.f32.mrb[0].mxu0 }
 0x1b9   :  { %893 = vrot.lane.b32.xlu1 %v3116_v54, %s3663_s9  ;;  %v868_v26 = vpop.f32.mrb[1].mxu0 }
 0x1ba   :  { %891 = vrot.lane.b32.xlu0 %v868_v26, %s3663_s9  ;;  %v3108_v14 = vpop.f32.mrb[2].mxu1 }
 0x1bb   :  { %v771_v56 = vpop.f32.mrb[3].mxu1 }
 0x1bc   :  { %v3119_v58 = vpop.f32.mrb[2].mxu0 }
 0x1bd   :  { %909 = vrot.lane.b32.xlu1 %v689_v55, %s3664_s5  ;;  %v878_v21 = vpop.f32.mrb[3].mxu0 }
 0x1be   :  { %907 = vrot.lane.b32.xlu0 %v688_v57, %s3664_s5 }
 0x1c0   :  { %v4015_v60 = vpop.f32.mrb[4].mxu0 }
 0x1c1   :  { %235 = vperm.xlu1 %3503, %v211_v50   ;;  %v4017_v61 = vpop.f32.mrb[5].mxu0 }
 0x1c2   :  { %230 = vperm.xlu0 %3504, %v210_v49  }
 0x1c4   :  { %v4019_v1 = vpop.f32.mrb[6].mxu0 }
 0x1c5   :  { %680 = vperm.xlu1 %3503, %v3518_v63   ;;  %v4021_v62 = vpop.f32.mrb[7].mxu0 }
 0x1c6   :  { %685 = vperm.xlu0 %3504, %v3520_v0  }
 0x1c7   :  { %v4025_v59 = vpop.f32.mrb[4].mxu1 }
 0x1c8   :  { %v4027_v3 = vpop.f32.mrb[5].mxu1 }
 0x1c9   :  { %895 = vrot.lane.b32.xlu1 %v878_v21, %s3663_s9 }
 0x1ca   :  { %897 = vrot.lane.b32.xlu0 %v3119_v58, %s3663_s9 }
 0x22b   :  { %v894_v4 = vpop.permute.xlu1 %893 }
 0x22c   :  { %v892_v29 = vpop.permute.xlu0 %891  ;;  %v921_v16 = vsel %vm919_vm10, %v3108_v14, %v894_v4 }
 0x22d   :  { %v920_v9 = vsel %vm919_vm10, %v771_v56, %v892_v29 }
 0x22f   :  { %v910_v7 = vpop.permute.xlu1 %909 }
 0x230   :  { %v908_v11 = vpop.permute.xlu0 %907  ;;  %v926_v23 = vsel %vm924_vm11, %v921_v16, %v910_v7 }
 0x231   :  { %v925_v18 = vsel %vm924_vm11, %v920_v9, %v908_v11 }
 0x232   :  { %3138 = vmatprep.mubr.msk.f32.mxu1 %vm945_vm12, %v925_v18 }
 0x233   :  { %3139 = vmatmul.mubr.msk.f32.vlgmr.msra.gmra.mrb[6].mxu1 %vm945_vm12, %v926_v23 }
 0x240   :  { %v236_v22 = vpop.permute.xlu1 %235 }
 0x241   :  { %v4036_v6 = vmul.f32 %v3825_v24, %v236_v22  ;;  %v231_v12 = vpop.permute.xlu0 %230 }
 0x242   :  { %v4039_v25 = vmul.f32 %v3825_v24, %v231_v12 }
 0x243   :  { %v560_v27 = vand.u32 2147483647, %v4036_v6  ;;  %v563_v28 = vand.u32 2139095040, %v4036_v6 }
 0x244   :  { %v459_v30 = vand.u32 2139095040, %v4039_v25  ;;  %v456_v34 = vand.u32 2147483647, %v4039_v25 }
 0x245   :  { %v564_v31 = vshrl.u32 %v563_v28, 23  ;;  %v567_v33 = vand.u32 8388607, %v560_v27 }
 0x246   :  { %v460_v37 = vshrl.u32 %v459_v30, 23  ;;  %v4049_v24 = vand.u32 8388607, %v456_v34 }
 0x247   :  { %v2872_v35 = vadd.s32 4294967169, %v564_v31  ;;  %v568_v43 = vor.u32 8388608, %v567_v33 }
 0x248   :  { %v2868_v39 = vadd.s32 4294967169, %v460_v37  ;;  %v464_v52 = vor.u32 8388608, %v4049_v24 }
 0x249   :  { %v570_v41 = vadd.s32 1, %v2872_v35  ;;  %v4051_v51 = vshll.u32 %v568_v43, 8 }
 0x24a   :  { %v466_v45 = vadd.s32 1, %v2868_v39 }
 0x24b   :  { %vm571_vm13 = vcmp.gt.s32.totalorder %v570_v41, 0 }
 0x24c   :  { %v572_v48 = vsel %vm571_vm13, %v570_v41, 0  ;;  %vm467_vm14 = vcmp.gt.s32.totalorder %v466_v45, 0 }
 0x24d   :  { %v573_v36 = vshrl.u32 %v572_v48, 5  ;;  %v574_v49 = vand.u32 31, %v572_v48  ;;  %v468_v50 = vsel %vm467_vm14, %v466_v45, 0 }
 0x24e   :  { %v4055_v14 = vshrl.u32 %v468_v50, 5  ;;  %v470_v55 = vand.u32 31, %v468_v50 }
 0x24f   :  { %v575_v54 = vsub.s32 32, %v574_v49  ;;  %v577_v26 = vshll.u32 %v3657_v38, %v574_v49  ;;  %v580_v56 = vshll.u32 %v3658_v40, %v574_v49  ;;  %v583_v57 = vshll.u32 %v3659_v42, %v574_v49 }
 0x250   :  { %v586_v58 = vshll.u32 %v3660_v44, %v574_v49  ;;  %v589_v21 = vshll.u32 %v3661_v46, %v574_v49  ;;  %vm592_vm15 = vcmp.lt.s32.totalorder %v573_v36, 1  ;;  %vm594_vm0 = vcmp.lt.s32.totalorder %v573_v36, 3 }
 0x251   :  { %v578_v63 = vshrl.u32 %v3658_v40, %v575_v54  ;;  %v581_v0 = vshrl.u32 %v3659_v42, %v575_v54  ;;  %v584_v4 = vshrl.u32 %v3660_v44, %v575_v54  ;;  %v576_v29 = vshrl.u32 %v3657_v38, %v575_v54 }
 0x252   :  { %v587_v7 = vshrl.u32 %v3661_v46, %v575_v54  ;;  %v590_v9 = vshrl.u32 %v3662_v53, %v575_v54  ;;  %v471_v23 = vsub.s32 32, %v470_v55  ;;  %vm595_vm2 = vcmp.lt.s32.totalorder %v573_v36, 4 }
 0x253   :  { %v579_v11 = vor.u32 %v578_v63, %v577_v26  ;;  %v582_v16 = vor.u32 %v581_v0, %v580_v56  ;;  %v585_v18 = vor.u32 %v584_v4, %v583_v57  ;;  %v473_v28 = vshll.u32 %v3657_v38, %v470_v55 }
 0x254   :  { %v588_v22 = vor.u32 %v587_v7, %v586_v58  ;;  %v591_v12 = vor.u32 %v590_v9, %v589_v21  ;;  %v476_v43 = vshll.u32 %v3658_v40, %v470_v55  ;;  %vm593_vm4 = vcmp.lt.s32.totalorder %v573_v36, 2 }
 0x255   :  { %v596_v30 = vsel %vm592_vm15, %v576_v29, %v579_v11  ;;  %v597_v31 = vsel %vm595_vm2, %v585_v18, 2102212464  ;;  %v600_v33 = vsel %vm592_vm15, %v579_v11, %v582_v16  ;;  %v604_v37 = vsel %vm592_vm15, %v582_v16, %v585_v18 }
 0x256   :  { %v598_v35 = vsel %vm594_vm0, %v582_v16, %v597_v31  ;;  %v601_v39 = vsel %vm595_vm2, %v588_v22, 920167782  ;;  %v605_v41 = vsel %vm595_vm2, %v591_v12, 1326507024  ;;  %v474_v48 = vshrl.u32 %v3658_v40, %v471_v23 }
 0x257   :  { %v602_v24 = vsel %vm594_vm0, %v585_v18, %v601_v39  ;;  %v606_v45 = vsel %vm594_vm0, %v588_v22, %v605_v41  ;;  %v599_v49 = vsel %vm593_vm4, %v596_v30, %v598_v35  ;;  %v477_v26 = vshrl.u32 %v3659_v42, %v471_v23 }
 0x258   :  { %v603_v50 = vsel %vm593_vm4, %v600_v33, %v602_v24  ;;  %v607_v54 = vsel %vm593_vm4, %v604_v37, %v606_v45  ;;  %v475_v63 = vor.u32 %v474_v48, %v473_v28  ;;  %v479_v36 = vshll.u32 %v3659_v42, %v470_v55 }
 0x259   :  { %v4078_v56 = vmul.u32.u64.low %v4051_v51, %v607_v54  ;;  %v4079_v57 = vmul.u32.u64.high %v4051_v51, %v607_v54, %v4078_v56  ;;  %v4082_v58 = vmul.u32.u64.low %v4051_v51, %v603_v50  ;;  %v4083_v21 = vmul.u32.u64.high %v4051_v51, %v603_v50, %v4082_v58 }
 0x25a   :  { %v478_v0 = vor.u32 %v477_v26, %v476_v43  ;;  %v480_v4 = vshrl.u32 %v3660_v44, %v471_v23  ;;  %v482_v40 = vshll.u32 %v3660_v44, %v470_v55  ;;  %v483_v29 = vshrl.u32 %v3661_v46, %v471_v23 }
 0x25b   :  { %v485_v7 = vshll.u32 %v3661_v46, %v470_v55  ;;  %v486_v9 = vshrl.u32 %v3662_v53, %v471_v23  ;;  %v472_v11 = vshrl.u32 %v3657_v38, %v471_v23  ;;  %vm488_vm5 = vcmp.lt.s32.totalorder %v4055_v14, 1 }
 0x25c   :  { %v481_v16 = vor.u32 %v480_v4, %v479_v36  ;;  %v504_v18 = vshll.u32 %v464_v52, 8  ;;  %v615_v22 = vmul.u32 %v4051_v51, %v599_v49  ;;  %vm617_vm6 = vc.u32 %v4079_v57, %v4082_v58 }
 0x25d   :  { %v618_v42 = vadd.s32 1, %v4083_v21  ;;  %v484_v12 = vor.u32 %v483_v29, %v482_v40  ;;  %v487_v44 = vor.u32 %v486_v9, %v485_v7  ;;  %vm490_vm7 = vcmp.lt.s32.totalorder %v4055_v14, 3 }
 0x25e   :  { %vm491_vm8 = vcmp.lt.s32.totalorder %v4055_v14, 4  ;;  %v496_v46 = vsel %vm488_vm5, %v475_v63, %v478_v0  ;;  %v500_v51 = vsel %vm488_vm5, %v478_v0, %v481_v16  ;;  %vm489_vm9 = vcmp.lt.s32.totalorder %v4055_v14, 2 }
 0x25f   :  { %v619_v38 = vsel %vm617_vm6, %v618_v42, %v4083_v21  ;;  %v493_v53 = vsel %vm491_vm8, %v481_v16, 2102212464  ;;  %v497_v55 = vsel %vm491_vm8, %v484_v12, 920167782  ;;  %v501_v28 = vsel %vm491_vm8, %v487_v44, 1326507024 }
 0x260   :  { %v620_v52 = vadd.s32 %v619_v38, %v615_v22  ;;  %v498_v23 = vsel %vm490_vm7, %v481_v16, %v497_v55  ;;  %v492_v30 = vsel %vm488_vm5, %v472_v11, %v475_v63  ;;  %v494_v31 = vsel %vm490_vm7, %v478_v0, %v493_v53 }
 0x261   :  { %v499_v33 = vsel %vm489_vm9, %v496_v46, %v498_v23  ;;  %v502_v37 = vsel %vm490_vm7, %v484_v12, %v501_v28  ;;  %v495_v49 = vsel %vm489_vm9, %v492_v30, %v494_v31  ;;  %v616_v22 = vadd.s32 %v4082_v58, %v4079_v57 }
 0x262   :  { %v621_v35 = vadd.s32 536870912, %v620_v52  ;;  %v503_v39 = vsel %vm489_vm9, %v500_v51, %v502_v37  ;;  %v4106_v41 = vmul.u32.u64.low %v504_v18, %v499_v33  ;;  %v4107_v43 = vmul.u32.u64.high %v504_v18, %v499_v33, %v4106_v41 }
 0x263   :  { %v4109_v24 = vmul.u32.u64.low %v504_v18, %v503_v39  ;;  %v4110_v45 = vmul.u32.u64.high %v504_v18, %v503_v39, %v4109_v24  ;;  %v511_v26 = vmul.u32 %v504_v18, %v495_v49  ;;  %vm562_vm0 = vcmp.lt.s32.totalorder %v4036_v6, 0 }
 0x264   :  { %v622_v48 = vshrl.u32 %v621_v35, 30  ;;  %v514_v54 = vadd.s32 1, %v4107_v43  ;;  %vm561_vm2 = vcmp.le.f32.partialorder %v560_v27, 0.7853982  ;;  %vm458_vm4 = vcmp.lt.s32.totalorder %v4039_v25, 0 }
 0x265   :  { %vm513_vm13 = vc.u32 %v4110_v45, %v4106_v41  ;;  %v512_v33 = vadd.s32 %v4106_v41, %v4110_v45  ;;  %vm457_vm5 = vcmp.le.f32.partialorder %v456_v34, 0.7853982  ;;  %vm652_vm9 = vweird.f32 %v4036_v6 }
 0x266   :  { %v623_v50 = vshll.u32 %v622_v48, 30  ;;  %v515_v56 = vsel %vm513_vm13, %v514_v54, %v4107_v43  ;;  %v646_v58 = vsub.s32 4, %v622_v48 }
 0x267   :  { %v516_v21 = vadd.s32 %v515_v56, %v511_v26 }
 0x268   :  { %v624_v14 = vsub.s32 %v620_v52, %v623_v50 }
 0x269   :  { %v517_v0 = vadd.s32 536870912, %v516_v21 }
 0x26a   :  { %v626_v63 = vsub.s32 0, %v624_v14 }
 0x26b   :  { %v518_v4 = vshrl.u32 %v517_v0, 30 }
 0x26c   :  { %v2873_v36 = vmin.u32 %v626_v63, %v624_v14 }
 0x26d   :  { %v519_v29 = vshll.u32 %v518_v4, 30 }
 0x26e   :  { %v628_v40 = vclz %v2873_v36  ;;  %v542_v36 = vsub.s32 4, %v518_v4 }
 0x26f   :  { %v520_v9 = vsub.s32 %v516_v21, %v519_v29 }
 0x270   :  { %v2874_v7 = vadd.s32 4294967294, %v628_v40  ;;  %v543_v27 = vsel %vm458_vm4, %v542_v36, %v518_v4 }
 0x271   :  { %v522_v16 = vsub.s32 0, %v520_v9 }
 0x272   :  { %vm2875_vm14 = vcmp.lt.s32.totalorder %v2874_v7, 0 }
 0x273   :  { %v631_v11 = vsel %vm2875_vm14, 0, %v2874_v7  ;;  %v2869_v12 = vmin.u32 %v522_v16, %v520_v9  ;;  %v545_v16 = vsel %vm457_vm5, 0, %v543_v27  ;;  %v1157_v27 = vld [vmem:[%s4584_s13 + $0x10] sm:$0xff] }
 0x274   :  { %v632_v18 = vsub.s32 32, %v631_v11  ;;  %v636_v42 = vsub.s32 4294967266, %v631_v11  ;;  %v633_v44 = vshll.u32 %v624_v14, %v631_v11  ;;  %v647_v14 = vsel %vm562_vm0, %v646_v58, %v622_v48 }
 0x275   :  { %v524_v53 = vclz %v2869_v12  ;;  %v649_v63 = vsel %vm561_vm2, 0, %v647_v14  ;;  %v549_v12 = vadd.s32 3, %v545_v16  ;;  %v1159_v16 = vld [vmem:[%s4584_s13 + $0x20] sm:$0xff] }
 0x276   :  { %v634_v46 = vshrl.u32 %v616_v22, %v632_v18  ;;  %v637_v38 = vadd.s32 127, %v636_v42  ;;  %v653_v40 = vadd.s32 3, %v649_v63 }
 0x277   :  { %v2870_v52 = vadd.s32 4294967294, %v524_v53 }
 0x278   :  { %v635_v55 = vor.u32 %v634_v46, %v633_v44  ;;  %v638_v51 = vshll.u32 %v637_v38, 23  ;;  %v550_v38 = vand.u32 3, %v549_v12  ;;  %v1162_v12 = vld [vmem:[%s4584_s13 + $0x38] sm:$0xff] }
 0x279   :  { %vm2871_vm15 = vcmp.lt.s32.totalorder %v2870_v52, 0 }
 0x27a   :  { %v639_v23 = vor.u32 4788187, %v638_v51  ;;  %v642_v30 = vcvt.s32.f32 %v635_v55  ;;  %v527_v31 = vsel %vm2871_vm15, 0, %v2870_v52  ;;  %v1047_v55 = vld [vmem:[%s4582_s11] sm:$0xff]  ;;  %v1048_v51 = vld [vmem:[%s4582_s11 + $0x8] sm:$0xff]  ;;  %v686_v52 = vpop.permute.xlu0 %685  ;;  %vm555_vm13 = vcmp.eq.s32.totalorder %v550_v38, 2 }
 0x27b   :  { %v528_v37 = vsub.s32 32, %v527_v31  ;;  %v532_v35 = vsub.s32 4294967266, %v527_v31  ;;  %v529_v39 = vshll.u32 %v520_v9, %v527_v31  ;;  %v654_v9 = vand.u32 3, %v653_v40 }
 0x27c   :  { %v640_v28 = vand.u32 2147483647, %v639_v23  ;;  %v3354_v23 = vpack.c.bf16 %v1048_v51, %v1047_v55  ;;  %vm552_vm14 = vcmp.eq.s32.totalorder %v550_v38, 0  ;;  %vm551_vm15 = vcmp.lt.s32.totalorder %v550_v38, 2  ;;  %v1165_v38 = vld [vmem:[%s4584_s13 + $0x50] sm:$0xff] }
 0x27d   :  { %v530_v43 = vshrl.u32 %v512_v33, %v528_v37  ;;  %v533_v24 = vadd.s32 127, %v532_v35  ;;  %vm659_vm6 = vcmp.eq.s32.totalorder %v654_v9, 2  ;;  %vm656_vm7 = vcmp.eq.s32.totalorder %v654_v9, 0  ;;  %v1049_v37 = vld [vmem:[%s4582_s11 + $0x10] sm:$0xff]  ;;  %v1050_v35 = vld [vmem:[%s4582_s11 + $0x18] sm:$0xff] }
 0x27e   :  { %v643_v57 = vmul.f32 %v642_v30, %v640_v28  ;;  %vm655_vm8 = vcmp.lt.s32.totalorder %v654_v9, 2  ;;  %3355 = vmatprep.subr.bf16.mxu1 %v3354_v23  ;;  %v3358_v58 = vpack.c.bf16 %v1050_v35, %v1049_v37  ;;  %v1158_v9 = vld [vmem:[%s4584_s13 + $0x18] sm:$0xff] }
 0x27f   :  { %v531_v50 = vor.u32 %v530_v43, %v529_v39  ;;  %v534_v54 = vshll.u32 %v533_v24, 23  ;;  %3357 = vmatpush3.bf16.msra.mxu1 %v3354_v23 }
 0x280   :  { %v644_v49 = vxor.u32 2147483648, %v643_v57  ;;  %3359 = vmatprep.subr.bf16.mxu1 %v3358_v58 }
 0x281   :  { %v535_v56 = vor.u32 4788187, %v534_v54  ;;  %v538_v21 = vcvt.s32.f32 %v531_v50  ;;  %v681_v50 = vpop.permute.xlu1 %680 }
 0x282   :  { %v645_v26 = vsel %vm562_vm0, %v644_v49, %v643_v57  ;;  %vm548_vm0 = vweird.f32 %v4039_v25 }
 0x283   :  { %v648_v41 = vsel %vm561_vm2, %v4036_v6, %v645_v26  ;;  %v536_v45 = vand.u32 2147483647, %v535_v56  ;;  %3361 = vmatpush3.bf16.msra.mxu1 %v3358_v58  ;;  %v2884_v26 = vld [vmem:[%s4581_s10] ss:$0 sm:$0xff] }
 0x284   :  { %3521 = vcosq.f32 %v648_v41 }
 0x285   :  { %3523 = vsinq.f32 %v648_v41  ;;  %v539_v0 = vmul.f32 %v538_v21, %v536_v45  ;;  %v898_v45 = vpop.permute.xlu0 %897 }
 0x287   :  { %v540_v29 = vxor.u32 2147483648, %v539_v0 }
 0x289   :  { %v541_v7 = vsel %vm458_vm4, %v540_v29, %v539_v0 }
 0x28a   :  { %v544_v48 = vsel %vm457_vm5, %v4039_v25, %v541_v7 }
 0x28b   :  { %3525 = vcosq.f32 %v544_v48 }
 0x28c   :  { %3527 = vsinq.f32 %v544_v48 }
 0x28e   :  { %v3522_v11 = vpop.eup %3521 }
 0x28f   :  { %v3524_v22 = vpop.eup %3523  ;;  %v660_v18 = vxor.u32 2147483648, %v3522_v11 }
 0x290   :  { %v657_v42 = vxor.u32 2147483648, %v3524_v22 }
 0x291   :  { %v661_v44 = vsel %vm659_vm6, %v660_v18, %v3524_v22  ;;  %v1160_v22 = vld [vmem:[%s4584_s13 + $0x28] sm:$0xff]  ;;  %vm1532_vm6 = vcmask 130048  }
 0x292   :  { %v658_v46 = vsel %vm656_vm7, %v3522_v11, %v657_v42  ;;  %v3366_v11 = vpack.c.bf16 %v1158_v9, %v1157_v27  ;;  %v3370_v18 = vpack.c.bf16 %v1160_v22, %v1159_v16  ;;  %v1161_v42 = vld [vmem:[%s4584_s13 + $0x30] sm:$0xff] }
 0x293   :  { %v662_v34 = vsel %vm655_vm8, %v658_v46, %v661_v44  ;;  %v3374_v44 = vpack.c.bf16 %v1162_v12, %v1161_v42  ;;  %v1163_v46 = vld [vmem:[%s4584_s13 + $0x40] sm:$0xff] }
 0x294   :  { %v663_v4 = vsel %vm652_vm9, nan, %v662_v34  ;;  %v1164_v34 = vld [vmem:[%s4584_s13 + $0x48] sm:$0xff] }
 0x295   :  { %v667_v53 = vmul.f32 0.4, %v663_v4  ;;  %v3526_v28 = vpop.eup %3525  ;;  %v3378_v4 = vpack.c.bf16 %v1164_v34, %v1163_v46 }
 0x296   :  { %v3528_v31 = vpop.eup %3527  ;;  %v556_v33 = vxor.u32 2147483648, %v3526_v28 }
 0x297   :  { %v691_v30 = vmul.f32 %v686_v52, %v667_v53  ;;  %v553_v6 = vxor.u32 2147483648, %v3528_v31  ;;  %v1166_v53 = vld [vmem:[%s4584_s13 + $0x58] sm:$0xff] }
 0x298   :  { %v557_v57 = vsel %vm555_vm13, %v556_v33, %v3528_v31  ;;  %v3382_v55 = vpack.c.bf16 %v1166_v53, %v1165_v38 }
 0x299   :  { %913 = vrot.lane.b32.xlu0 %v691_v30, %s3664_s5  ;;  %v554_v39 = vsel %vm552_vm14, %v3526_v28, %v553_v6  ;;  %v4197_v30 = vld [vmem:[%s4583_s12] ss:$0 sm:$0xff] }
 0x29a   :  { %v558_v43 = vsel %vm551_vm15, %v554_v39, %v557_v57 }
 0x29b   :  { %v559_v24 = vsel %vm548_vm0, nan, %v558_v43 }
 0x29c   :  { %v666_v49 = vmul.f32 0.4, %v559_v24 }
 0x29d   :  { %1337 = vrot.lane.b32.xlu0 %v4019_v1, %s3663_s9  ;;  %v896_v1 = vpop.permute.xlu1 %895 }
 0x29e   :  { %v690_v54 = vmul.f32 %v681_v50, %v666_v49  ;;  %v922_v63 = vsel %vm919_vm10, %v4027_v3, %v896_v1  ;;  %v1155_v3 = vld [vmem:[%s4584_s13] sm:$0xff] }
 0x2a0   :  { %911 = vrot.lane.b32.xlu1 %v690_v54, %s3664_s5 }
 0x2a4   :  { %1335 = vrot.lane.b32.xlu1 %v4021_v62, %s3663_s9  ;;  %v923_v62 = vsel %vm919_vm10, %v4025_v59, %v898_v45  ;;  %v1156_v59 = vld [vmem:[%s4584_s13 + $0x8] sm:$0xff] }
 0x2a5   :  { %v3362_v48 = vpack.c.bf16 %v1156_v59, %v1155_v3 }
 0x2a7   :  { %3363 = vmatprep.subr.bf16.mxu1 %v3362_v48 }
 0x306   :  { %v3140_v25 = vpop.f32.mrb[6].mxu1 }
 0x307   :  { %v1024_v14 = vpop.f32.mrb[7].mxu1  ;;  %v1030_v41 = vadd.f32 %v3140_v25, %v2884_v26 }
 0x308   :  { %v1025_v56 = vadd.f32 %v2884_v26, %v1024_v14 }
 0x30a   :  { %3529 = vtanh.f32 %v1025_v56 }
 0x30b   :  { %3531 = vtanh.f32 %v1030_v41  ;;  %v914_v21 = vpop.permute.xlu0 %913 }
 0x30c   :  { %v928_v29 = vsel %vm924_vm11, %v923_v62, %v914_v21 }
 0x30f   :  { %v1338_v58 = vpop.permute.xlu0 %1337 }
 0x310   :  { %v1350_v50 = vsel %vm919_vm10, %v4015_v60, %v1338_v58 }
 0x312   :  { %v912_v0 = vpop.permute.xlu1 %911 }
 0x313   :  { %v927_v40 = vsel %vm924_vm11, %v922_v63, %v912_v0 }
 0x314   :  { %v3530_v36 = vpop.eup %3529  ;;  %3141 = vmatprep.mubr.msk.f32.mxu1 %vm945_vm12, %v927_v40 }
 0x315   :  { %3142 = vmatmul.mubr.msk.f32.gmra.mrb[8].mxu1 %vm945_vm12, %v928_v29  ;;  %v3532_v7 = vpop.eup %3531  ;;  %vm1359_vm12 = vcmask 785408  }
 0x316   :  { %3152 = vmatprep.mubr.msk.f32.mxu1 %vm919_vm10, %v3530_v36  ;;  %v1336_v39 = vpop.permute.xlu1 %1335 }
 0x317   :  { %v1349_v24 = vsel %vm919_vm10, %v4017_v61, %v1336_v39  ;;  %v2898_v61 = vld [vmem:[%s4585_s14] ss:$0 sm:$0xff] }
 0x319   :  { %3153 = vmatmul.mubr.msk.f32.vlgmr.msra.gmra.mrb[10].mxu1 %vm919_vm10, %v3532_v7 }
 0x31a   :  { %3365 = vmatpush3.bf16.msra.mxu1 %v3362_v48 }
 0x31b   :  { %3367 = vmatprep.subr.bf16.mxu1 %v3366_v11 }
 0x31e   :  { %3369 = vmatpush3.bf16.msra.mxu1 %v3366_v11 }
 0x31f   :  { %3371 = vmatprep.subr.bf16.mxu1 %v3370_v18 }
 0x322   :  { %3373 = vmatpush3.bf16.msra.mxu1 %v3370_v18 }
 0x323   :  { %3375 = vmatprep.subr.bf16.mxu1 %v3374_v44 }
 0x326   :  { %3377 = vmatpush3.bf16.msra.mxu1 %v3374_v44 }
 0x327   :  { %3379 = vmatprep.subr.bf16.mxu1 %v3378_v4 }
 0x32a   :  { %3381 = vmatpush3.bf16.msra.mxu1 %v3378_v4 }
 0x32b   :  { %3383 = vmatprep.subr.bf16.mxu1 %v3382_v55 }
 0x32e   :  { %3385 = vmatpush3.bf16.msra.mxu1 %v3382_v55 }
 0x3e8   :  { %v3143_v51 = vpop.f32.mrb[8].mxu1 }
 0x3e9   :  { %v1040_v52 = vadd.f32 %v3143_v51, %v2884_v26  ;;  %v1034_v23 = vpop.f32.mrb[9].mxu1 }
 0x3ea   :  { %v1035_v28 = vadd.f32 %v2884_v26, %v1034_v23 }
 0x3ec   :  { %3533 = vtanh.f32 %v1035_v28  ;;  %v3154_v31 = vpop.f32.mrb[10].mxu1 }
 0x3ed   :  { %3535 = vtanh.f32 %v1040_v52  ;;  %v4200_v33 = vadd.f32 %v3154_v31, %v4197_v30  ;;  %v1136_v6 = vpop.f32.mrb[11].mxu1 }
 0x3ee   :  { %v4203_v37 = vadd.f32 %v4197_v30, %v1136_v6 }
 0x3ef   :  { %1345 = vrot.lane.b32.xlu0 %v4200_v33, %s3664_s5 }
 0x3f0   :  { %1343 = vrot.lane.b32.xlu1 %v4203_v37, %s3664_s5 }
 0x3f6   :  { %v3534_v35 = vpop.eup %3533 }
 0x3f7   :  { %v3536_v57 = vpop.eup %3535  ;;  %3155 = vmatprep.mubr.msk.f32.mxu1 %vm919_vm10, %v3534_v35 }
 0x3f8   :  { %3156 = vmatmul.mubr.msk.f32.gmra.mrb[12].mxu1 %vm919_vm10, %v3536_v57 }
 0x461   :  { %v1346_v43 = vpop.permute.xlu0 %1345 }
 0x462   :  { %v1344_v49 = vpop.permute.xlu1 %1343  ;;  %v1352_v26 = vsel %vm924_vm11, %v1350_v50, %v1346_v43 }
 0x463   :  { %v1351_v54 = vsel %vm924_vm11, %v1349_v24, %v1344_v49 }
 0x464   :  { %3192 = vmatprep.mubr.msk.f32.mxu1 %vm1359_vm12, %v1351_v54 }
 0x465   :  { %3193 = vmatmul.mubr.msk.f32.vlgmr.msra.gmra.mrb[14].mxu1 %vm1359_vm12, %v1352_v26 }
 0x466   :  { %3250 = vmatprep.mubr.msk.f32.mxu1 %vm692_vm3, %v3813_v19 }
 0x4cb   :  { %v4221_v25 = vpop.f32.mrb[12].mxu1 }
 0x4cc   :  { %v4223_v14 = vpop.f32.mrb[13].mxu1 }
 0x538   :  { %v3194_v60 = vpop.f32.mrb[14].mxu1 }
 0x539   :  { %v1438_v56 = vadd.f32 %v3194_v60, %v2898_v61  ;;  %v1432_v41 = vpop.f32.mrb[15].mxu1 }
 0x53a   :  { %v1433_v45 = vadd.f32 %v2898_v61, %v1432_v41 }
 0x53b   :  { %v1452_v1 = vand.u32 2147483647, %v1438_v56  ;;  %v1450_v44 = vmax.f32 %v1438_v56, 0.0  ;;  %v1442_v52 = vmul.f32 0.5, %v1438_v56 }
 0x53c   :  { %v1451_v21 = vand.u32 2147483647, %v1433_v45  ;;  %v1449_v4 = vmax.f32 %v1433_v45, 0.0  ;;  %v1441_v23 = vmul.f32 0.5, %v1433_v45 }
 0x53d   :  { %v1454_v63 = vsub.f32 0.0, %v1452_v1 }
 0x53e   :  { %v1453_v0 = vsub.f32 0.0, %v1451_v21 }
 0x53f   :  { %v1457_v36 = vmul.f32 1.442695, %v1454_v63 }
 0x540   :  { %v1455_v62 = vmul.f32 1.442695, %v1453_v0 }
 0x541   :  { %3537 = vpow2.f32 %v1457_v36  ;;  %v3666_v36 = vmov 0.0|0.0  }
 0x542   :  { %3539 = vpow2.f32 %v1455_v62  ;;  %3386 = vmatprep.subr.bf16.mxu0 %v3666_v36 }
 0x54b   :  { %v3538_v40 = vpop.eup %3537 }
 0x54c   :  { %v3540_v29 = vpop.eup %3539  ;;  %v1468_v7 = vadd.f32 1.0, %v3538_v40  ;;  %v1471_v59 = vmul.f32 -0.5, %v3538_v40  ;;  %v1474_v9 = vand.u32 2147483647, %v3538_v40 }
 0x54d   :  { %v1459_v3 = vadd.f32 1.0, %v3540_v29  ;;  %v1462_v27 = vmul.f32 -0.5, %v3540_v29  ;;  %v1465_v16 = vand.u32 2147483647, %v3540_v29 }
 0x54e   :  { %3541 = vlog2.f32 %v1468_v7  ;;  %v1472_v48 = vadd.f32 1.0, %v1471_v59  ;;  %vm1475_vm2 = vcmp.lt.f32.partialorder %v1474_v9, 0.0004427343 }
 0x54f   :  { %3543 = vlog2.f32 %v1459_v3  ;;  %v1463_v11 = vadd.f32 1.0, %v1462_v27  ;;  %vm1466_vm4 = vcmp.lt.f32.partialorder %v1465_v16, 0.0004427343 }
 0x550   :  { %v1473_v12 = vmul.f32 %v3538_v40, %v1472_v48  ;;  %3545 = vtanh.f32 %v1442_v52  ;;  %v2901_v48 = vld [vmem:[%s4588_s17] ss:$0 sm:$0xff] }
 0x551   :  { %v1464_v34 = vmul.f32 %v3540_v29, %v1463_v11  ;;  %3547 = vtanh.f32 %v1441_v23  ;;  %v1172_v23 = vld [vmem:[%s4586_s15 + $0x20] sm:$0xff] }
 0x558   :  { %v3542_v22 = vpop.eup %3541 }
 0x559   :  { %v3544_v18 = vpop.eup %3543  ;;  %v1470_v42 = vmul.f32 0.6931472, %v3542_v22 }
 0x55a   :  { %v1461_v46 = vmul.f32 0.6931472, %v3544_v18  ;;  %v3546_v28 = vpop.eup %3545  ;;  %v2859_v18 = vld [vmem:[%s4604_s0] ss:$0 sm:$0xff] }
 0x55b   :  { %v1476_v38 = vsel %vm1475_vm2, %v1473_v12, %v1470_v42  ;;  %v3548_v31 = vpop.eup %3547  ;;  %v1446_v6 = vadd.f32 1.0, %v3546_v28  ;;  %vm206_vm5 = vcmp.eq.s32.totalorder %v2859_v18, %v3805_v15  ;;  %v1168_v15 = vld [vmem:[%s4586_s15] sm:$0xff]  ;;  %v1173_v28 = vld [vmem:[%s4586_s15 + $0x28] sm:$0xff] }
 0x55c   :  { %v1478_v53 = vadd.f32 %v1476_v38, %v1450_v44  ;;  %v1467_v55 = vsel %vm1466_vm4, %v1464_v34, %v1461_v46  ;;  %v1445_v35 = vadd.f32 1.0, %v3548_v31  ;;  %v4250_v46 = vsel %vm206_vm5, 1.0, %v3653_v2 }
 0x55d   :  { %v1477_v51 = vadd.f32 %v1467_v55, %v1449_v4  ;;  %v1448_v57 = vmul.f32 0.5, %v1446_v6  ;;  %v3397_v31 = vpack.c.bf16 %v1173_v28, %v1172_v23  ;;  %v1174_v6 = vld [vmem:[%s4586_s15 + $0x30] sm:$0xff] }
 0x55e   :  { %1483 = vrot.lane.b32.xlu0 %v1478_v53, %s3665_s26  ;;  %v1447_v39 = vmul.f32 0.5, %v1445_v35  ;;  %v1170_v53 = vld [vmem:[%s4586_s15 + $0x10] sm:$0xff]  ;;  %v1175_v35 = vld [vmem:[%s4586_s15 + $0x38] sm:$0xff] }
 0x55f   :  { %1481 = vrot.lane.b32.xlu1 %v1477_v51, %s3665_s26  ;;  %v1171_v51 = vld [vmem:[%s4586_s15 + $0x18] sm:$0xff] }
 0x560   :  { %v3393_v52 = vpack.c.bf16 %v1171_v51, %v1170_v53 }
 0x5d0   :  { %v1484_v58 = vpop.permute.xlu0 %1483 }
 0x5d1   :  { %v1488_v43 = vmul.f32 %v1484_v58, %v1448_v57  ;;  %v1482_v24 = vpop.permute.xlu1 %1481  ;;  %v3401_v57 = vpack.c.bf16 %v1175_v35, %v1174_v6  ;;  %v1176_v58 = vld [vmem:[%s4586_s15 + $0x40] sm:$0xff]  ;;  %v2918_v6 = vld [vmem:[%s4584_s13 + $0x68] sm:$0xff]  ;;  %v2919_v35 = vld [vmem:[%s4584_s13 + $0x70] sm:$0xff] }
 0x5d2   :  { %v1487_v49 = vmul.f32 %v1482_v24, %v1447_v39  ;;  %v1177_v39 = vld [vmem:[%s4586_s15 + $0x48] sm:$0xff]  ;;  %v1178_v24 = vld [vmem:[%s4586_s15 + $0x50] sm:$0xff] }
 0x5d3   :  { %v1492_v50 = vsel %vm919_vm10, %v1488_v43, 0.0 }
 0x5d4   :  { %1493 = vadd.xlane.f32.xlu0 %v1492_v50  ;;  %v1489_v54 = vsel %vm919_vm10, %v1487_v49, 0.0 }
 0x5d5   :  { %1490 = vadd.xlane.f32.xlu1 %v1489_v54 }
 0x661   :  { %v1494_v26 = vpop.xlane.xlu0 %1493 }
 0x662   :  { %v1497_v61 = vmul.f32 0.03125, %v1494_v26  ;;  %v1491_v60 = vpop.xlane.xlu1 %1490 }
 0x663   :  { %v1496_v56 = vmul.f32 0.03125, %v1491_v60 }
 0x664   :  { %v1499_v41 = vsub.f32 %v1488_v43, %v1497_v61  ;;  %v3405_v43 = vpack.c.bf16 %v1177_v39, %v1176_v58  ;;  %v2920_v39 = vld [vmem:[%s4584_s13 + $0x78] sm:$0xff] }
 0x665   :  { %v1498_v45 = vsub.f32 %v1487_v49, %v1496_v56  ;;  %v1179_v49 = vld [vmem:[%s4586_s15 + $0x58] sm:$0xff] }
 0x666   :  { %v1501_v1 = vmul.f32 %v1499_v41, %v1499_v41  ;;  %v3409_v50 = vpack.c.bf16 %v1179_v49, %v1178_v24  ;;  %v3417_v24 = vpack.c.bf16 %v2920_v39, %v2919_v35  ;;  %v2921_v49 = vld [vmem:[%s4584_s13 + $0x80] sm:$0xff] }
 0x667   :  { %v1500_v21 = vmul.f32 %v1498_v45, %v1498_v45 }
 0x668   :  { %v1505_v63 = vsel %vm919_vm10, %v1501_v1, 0.0 }
 0x669   :  { %1506 = vadd.xlane.f32.xlu1 %v1505_v63  ;;  %v1502_v0 = vsel %vm919_vm10, %v1500_v21, 0.0 }
 0x66a   :  { %1503 = vadd.xlane.f32.xlu0 %v1502_v0 }
 0x67a   :  { %1781 = vrot.lane.b32.xlu1 %v4200_v33, %s3663_s9 }
 0x680   :  { %1779 = vrot.lane.b32.xlu0 %v4203_v37, %s3663_s9  ;;  %v2902_v37 = vld [vmem:[%s4589_s18] ss:$0 sm:$0xff] }
 0x6f6   :  { %v1507_v62 = vpop.xlane.xlu1 %1506 }
 0x6f7   :  { %v1509_v40 = vmul.f32 0.03125, %v1507_v62  ;;  %v1504_v29 = vpop.xlane.xlu0 %1503 }
 0x6f8   :  { %v1508_v7 = vmul.f32 0.03125, %v1504_v29 }
 0x6f9   :  { %v1511_v3 = vadd.f32 1e-05, %v1509_v40 }
 0x6fa   :  { %v1510_v59 = vadd.f32 1e-05, %v1508_v7  ;;  %v1782_v40 = vpop.permute.xlu1 %1781 }
 0x6fb   :  { %3549 = vrsqrt.f32 %v1511_v3  ;;  %v1780_v62 = vpop.permute.xlu0 %1779 }
 0x6fc   :  { %3551 = vrsqrt.f32 %v1510_v59 }
 0x705   :  { %v3550_v27 = vpop.eup %3549 }
 0x706   :  { %v3552_v33 = vpop.eup %3551  ;;  %v1515_v9 = vmul.f32 %v3550_v27, %v1499_v41 }
 0x707   :  { %v1514_v11 = vmul.f32 %v3552_v33, %v1498_v45  ;;  %v4351_v33 = vld [vmem:[%s4587_s16] ss:$0 sm:$0xff] }
 0x708   :  { %v1523_v16 = vmul.f32 %v2901_v48, %v1515_v9 }
 0x709   :  { %v1522_v22 = vmul.f32 %v2901_v48, %v1514_v11 }
 0x70a   :  { %v1531_v42 = vadd.f32 %v2902_v37, %v1523_v16 }
 0x70b   :  { %v1530_v12 = vadd.f32 %v2902_v37, %v1522_v22 }
 0x70d   :  { %v3387_v44 = vpack.c.bf16 %v1531_v42, %v1530_v12 }
 0x70f   :  { %3388 = vmatpush3.bf16.msra.mxu0 %v3387_v44 }
 0x712   :  { %3200 = vmatmul.mubr.msk.f32.vlgmr.msra.gmra.mrb[8].mxu0 %vm1532_vm6, %v4250_v46 }
 0x713   :  { %3204 = vmatprep.mubr.msk.f32.mxu0 %vm692_vm3, %v3813_v19 }
 0x7e5   :  { %v1602_v34 = vpop.f32.mrb[8].mxu0 }
 0x7e6   :  { %v4257_v4 = vadd.f32 %v1602_v34, %v3868_v5  ;;  %v3201_v38 = vpop.f32.mrb[9].mxu0  ;;  %v1169_v5 = vld [vmem:[%s4586_s15 + $0x8] sm:$0xff] }
 0x7e7   :  { %v3389_v55 = vpack.c.bf16 %v1169_v5, %v1168_v15 }
 0x7e8   :  { %3202 = vmatprep.subr.mxu0 %v4257_v4  ;;  %3248 = vmatprep.subr.mxu1 %v4257_v4 }
 0x7e9   :  { %3203 = vmatpush3.msra.mxu0 %v4257_v4  ;;  %3249 = vmatpush3.msra.mxu1 %v4257_v4 }
 0x7ea   :  { %3205 = vmatmul.mubr.msk.f32.vlgmr.msra.gmra.mrb[10].mxu0 %vm692_vm3, %v3890_v13  ;;  %3210 = vmatprep.subr.mxu0 %v4257_v4 }
 0x7eb   :  { %3251 = vmatmul.mubr.msk.f32.vlgmr.msra.gmra.mrb[16].mxu1 %vm692_vm3, %v3890_v13  ;;  %3253 = vmatprep.subr.mxu1 %v4257_v4 }
 0x7ec   :  { %3207 = vmatprep.mubr.msk.f32.mxu0 %vm692_vm3, %v3967_v32  ;;  %3211 = vmatpush3.msra.mxu0 %v4257_v4 }
 0x7ed   :  { %3254 = vmatpush3.msra.mxu1 %v4257_v4  ;;  %3255 = vmatprep.mubr.msk.f32.mxu1 %vm692_vm3, %v3816_v20 }
 0x7ee   :  { %3208 = vmatmul.mubr.msk.f32.gmra.mrb[12].mxu0 %vm692_vm3, %v3982_v47  ;;  %3390 = vmatprep.subr.bf16.mxu0 %v3389_v55 }
 0x7ef   :  { %3256 = vmatmul.mubr.msk.f32.vlgmr.msra.gmra.mrb[18].mxu1 %vm692_vm3, %v3879_v10  ;;  %3212 = vmatprep.mubr.msk.f32.mxu0 %vm692_vm3, %v3816_v20 }
 0x7f2   :  { %3213 = vmatmul.mubr.msk.f32.vlgmr.msra.gmra.mrb[14].mxu0 %vm692_vm3, %v3879_v10 }
 0x7f3   :  { %3215 = vmatprep.mubr.msk.f32.mxu0 %vm692_vm3, %v3875_v8  ;;  %3392 = vmatpush3.bf16.msra.mxu0 %v3389_v55 }
 0x7f4   :  { %3394 = vmatprep.subr.bf16.mxu0 %v3393_v52 }
 0x7f6   :  { %3216 = vmatmul.mubr.msk.f32.gmra.mrb[16].mxu0 %vm692_vm3, %v3895_v17 }
 0x7f7   :  { %3396 = vmatpush3.bf16.msra.mxu0 %v3393_v52 }
 0x7f8   :  { %3398 = vmatprep.subr.bf16.mxu0 %v3397_v31 }
 0x7fb   :  { %3400 = vmatpush3.bf16.msra.mxu0 %v3397_v31  ;;  %v2917_v31 = vld [vmem:[%s4584_s13 + $0x60] sm:$0xff] }
 0x7fc   :  { %3402 = vmatprep.subr.bf16.mxu0 %v3401_v57  ;;  %v3413_v58 = vpack.c.bf16 %v2918_v6, %v2917_v31 }
 0x7fe   :  { %3414 = vmatprep.subr.bf16.mxu1 %v3413_v58 }
 0x7ff   :  { %3404 = vmatpush3.bf16.msra.mxu0 %v3401_v57  ;;  %3416 = vmatpush3.bf16.msra.mxu1 %v3413_v58 }
 0x800   :  { %3406 = vmatprep.subr.bf16.mxu0 %v3405_v43  ;;  %3418 = vmatprep.subr.bf16.mxu1 %v3417_v24 }
 0x803   :  { %3408 = vmatpush3.bf16.msra.mxu0 %v3405_v43  ;;  %3420 = vmatpush3.bf16.msra.mxu1 %v3417_v24 }
 0x804   :  { %3410 = vmatprep.subr.bf16.mxu0 %v3409_v50 }
 0x807   :  { %3412 = vmatpush3.bf16.msra.mxu0 %v3409_v50  ;;  %v2922_v50 = vld [vmem:[%s4584_s13 + $0x88] sm:$0xff] }
 0x808   :  { %3437 = vmatprep.subr.bf16.mxu0 %v3666_v36 }
 0x8bd   :  { %v3206_v54 = vpop.f32.mrb[10].mxu0 }
 0x8be   :  { %v4324_v26 = vpop.f32.mrb[16].mxu1  ;;  %v1673_v61 = vpop.f32.mrb[11].mxu0  ;;  %v1808_v59 = vsel %vm919_vm10, %v3206_v54, %v1782_v40 }
 0x8bf   :  { %v4326_v60 = vpop.f32.mrb[17].mxu1  ;;  %v1807_v7 = vsel %vm919_vm10, %v1673_v61, %v1780_v62 }
 0x8c1   :  { %v4328_v56 = vpop.f32.mrb[12].mxu0 }
 0x8c2   :  { %v4330_v41 = vpop.f32.mrb[18].mxu1  ;;  %v4332_v45 = vpop.f32.mrb[13].mxu0 }
 0x8c3   :  { %v4334_v1 = vpop.f32.mrb[19].mxu1 }
 0x8c5   :  { %v3214_v21 = vpop.f32.mrb[14].mxu0 }
 0x8c6   :  { %1797 = vrot.lane.b32.xlu0 %v3214_v21, %s3664_s5  ;;  %v1758_v63 = vpop.f32.mrb[15].mxu0 }
 0x8c7   :  { %1795 = vrot.lane.b32.xlu1 %v1758_v63, %s3664_s5 }
 0x8c9   :  { %v4338_v0 = vpop.f32.mrb[16].mxu0 }
 0x8ca   :  { %v4340_v36 = vpop.f32.mrb[17].mxu0 }
 0x938   :  { %v1798_v29 = vpop.permute.xlu0 %1797 }
 0x939   :  { %v1796_v3 = vpop.permute.xlu1 %1795  ;;  %v1812_v48 = vsel %vm924_vm11, %v1808_v59, %v1798_v29 }
 0x93a   :  { %v1811_v27 = vsel %vm924_vm11, %v1807_v7, %v1796_v3  ;;  %v3421_v3 = vpack.c.bf16 %v2922_v50, %v2921_v49  ;;  %v2949_v49 = vld [vmem:[%s4585_s14 + $0x1] ss:$0 sm:$0xff] }
 0x93b   :  { %3242 = vmatprep.mubr.msk.f32.mxu0 %vm1359_vm12, %v1811_v27 }
 0x93c   :  { %3243 = vmatmul.mubr.msk.f32.vlgmr.msra.gmra.mrb[18].mxu0 %vm1359_vm12, %v1812_v48  ;;  %v2923_v48 = vld [vmem:[%s4584_s13 + $0x90] sm:$0xff]  ;;  %3422 = vmatprep.subr.bf16.mxu1 %v3421_v3 }
 0x93d   :  { %3424 = vmatpush3.bf16.msra.mxu1 %v3421_v3 }
 0xa0f   :  { %v3244_v9 = vpop.f32.mrb[18].mxu0 }
 0xa10   :  { %v4354_v11 = vadd.f32 %v3244_v9, %v4351_v33  ;;  %v1899_v37 = vpop.f32.mrb[19].mxu0  ;;  %v2924_v9 = vld [vmem:[%s4584_s13 + $0x98] sm:$0xff] }
 0xa11   :  { %v4357_v16 = vadd.f32 %v4351_v33, %v1899_v37 }
 0xa12   :  { %v1939_v22 = vand.u32 2147483647, %v4354_v11  ;;  %v1935_v63 = vmax.f32 %v4354_v11, 0.0 }
 0xa13   :  { %v1938_v18 = vand.u32 2147483647, %v4357_v16  ;;  %v1934_v29 = vmax.f32 %v4357_v16, 0.0 }
 0xa14   :  { %v1943_v42 = vsub.f32 0.0, %v1939_v22  ;;  %v3425_v22 = vpack.c.bf16 %v2924_v9, %v2923_v48 }
 0xa15   :  { %v1942_v12 = vsub.f32 0.0, %v1938_v18  ;;  %v2925_v18 = vld [vmem:[%s4584_s13 + $0xa0] sm:$0xff] }
 0xa16   :  { %v1948_v44 = vmul.f32 1.442695, %v1943_v42  ;;  %v2926_v42 = vld [vmem:[%s4584_s13 + $0xa8] sm:$0xff]  ;;  %3426 = vmatprep.subr.bf16.mxu1 %v3425_v22 }
 0xa17   :  { %v1946_v34 = vmul.f32 1.442695, %v1942_v12  ;;  %v3429_v12 = vpack.c.bf16 %v2926_v42, %v2925_v18  ;;  %3428 = vmatpush3.bf16.msra.mxu1 %v3425_v22 }
 0xa18   :  { %3553 = vpow2.f32 %v1948_v44  ;;  %v2927_v44 = vld [vmem:[%s4584_s13 + $0xb0] sm:$0xff] }
 0xa19   :  { %3555 = vpow2.f32 %v1946_v34  ;;  %v2928_v34 = vld [vmem:[%s4584_s13 + $0xb8] sm:$0xff]  ;;  %3430 = vmatprep.subr.bf16.mxu1 %v3429_v12 }
 0xa1b   :  { %3432 = vmatpush3.bf16.msra.mxu1 %v3429_v12 }
 0xa22   :  { %v3554_v38 = vpop.eup %3553 }
 0xa23   :  { %v3556_v15 = vpop.eup %3555  ;;  %v1963_v5 = vadd.f32 1.0, %v3554_v38  ;;  %v1966_v55 = vmul.f32 -0.5, %v3554_v38  ;;  %v1969_v23 = vand.u32 2147483647, %v3554_v38 }
 0xa24   :  { %v1954_v53 = vadd.f32 1.0, %v3556_v15  ;;  %v1957_v51 = vmul.f32 -0.5, %v3556_v15  ;;  %v1960_v57 = vand.u32 2147483647, %v3556_v15 }
 0xa25   :  { %3557 = vlog2.f32 %v1963_v5  ;;  %v1967_v52 = vadd.f32 1.0, %v1966_v55  ;;  %vm1970_vm7 = vcmp.lt.f32.partialorder %v1969_v23, 0.0004427343 }
 0xa26   :  { %3559 = vlog2.f32 %v1954_v53  ;;  %v1958_v28 = vadd.f32 1.0, %v1957_v51  ;;  %vm1961_vm8 = vcmp.lt.f32.partialorder %v1960_v57, 0.0004427343 }
 0xa27   :  { %v1968_v21 = vmul.f32 %v3554_v38, %v1967_v52  ;;  %v3433_v38 = vpack.c.bf16 %v2928_v34, %v2927_v44 }
 0xa28   :  { %v1959_v40 = vmul.f32 %v3556_v15, %v1958_v28 }
 0xa29   :  { %3434 = vmatprep.subr.bf16.mxu1 %v3433_v38 }
 0xa2a   :  { %3436 = vmatpush3.bf16.msra.mxu1 %v3433_v38 }
 0xa2f   :  { %v3558_v43 = vpop.eup %3557 }
 0xa30   :  { %v3560_v54 = vpop.eup %3559  ;;  %v1965_v61 = vmul.f32 0.6931472, %v3558_v43 }
 0xa31   :  { %v1956_v62 = vmul.f32 0.6931472, %v3560_v54 }
 0xa32   :  { %v1971_v7 = vsel %vm1970_vm7, %v1968_v21, %v1965_v61 }
 0xa33   :  { %v1991_v59 = vadd.f32 %v1971_v7, %v1935_v63  ;;  %v1962_v27 = vsel %vm1961_vm8, %v1959_v40, %v1956_v62 }
 0xa34   :  { %v1990_v37 = vadd.f32 %v1962_v27, %v1934_v29 }
 0xa35   :  { %2000 = vrot.lane.b32.xlu0 %v1991_v59, %s3665_s26 }
 0xa36   :  { %1998 = vrot.lane.b32.xlu1 %v1990_v37, %s3665_s26 }
 0xa39   :  { %2202 = vrot.lane.b32.xlu0 %v4330_v41, %s3663_s9  ;;  %v1919_v41 = vmul.f32 0.5, %v4354_v11 }
 0xa3a   :  { %2200 = vrot.lane.b32.xlu1 %v4334_v1, %s3663_s9  ;;  %v1918_v1 = vmul.f32 0.5, %v4357_v16 }
 0xa3b   :  { %3561 = vtanh.f32 %v1919_v41 }
 0xa3c   :  { %3563 = vtanh.f32 %v1918_v1 }
 0xa45   :  { %v3562_v15 = vpop.eup %3561 }
 0xa46   :  { %v3564_v5 = vpop.eup %3563  ;;  %v1927_v53 = vadd.f32 1.0, %v3562_v15 }
 0xa47   :  { %v1926_v55 = vadd.f32 1.0, %v3564_v5 }
 0xa48   :  { %v1931_v51 = vmul.f32 0.5, %v1927_v53 }
 0xa49   :  { %v1930_v23 = vmul.f32 0.5, %v1926_v55 }
 0xaa7   :  { %v2001_v52 = vpop.permute.xlu0 %2000 }
 0xaa8   :  { %v4407_v28 = vmul.f32 %v2001_v52, %v1931_v51  ;;  %v1999_v31 = vpop.permute.xlu1 %1998 }
 0xaa9   :  { %v4409_v6 = vmul.f32 %v1999_v31, %v1930_v23 }
 0xaaa   :  { %2210 = vrot.lane.b32.xlu0 %v4407_v28, %s3664_s5 }
 0xaab   :  { %2208 = vrot.lane.b32.xlu1 %v4409_v6, %s3664_s5  ;;  %v2203_v11 = vpop.permute.xlu0 %2202 }
 0xaac   :  { %v2201_v16 = vpop.permute.xlu1 %2200  ;;  %v2215_v39 = vsel %vm919_vm10, %v4324_v26, %v2203_v11 }
 0xaad   :  { %v2214_v57 = vsel %vm919_vm10, %v4326_v60, %v2201_v16 }
 0xb1c   :  { %v2211_v35 = vpop.permute.xlu0 %2210 }
 0xb1d   :  { %v2209_v58 = vpop.permute.xlu1 %2208  ;;  %v2217_v24 = vsel %vm924_vm11, %v2215_v39, %v2211_v35 }
 0xb1e   :  { %v2216_v43 = vsel %vm924_vm11, %v2214_v57, %v2209_v58 }
 0xb1f   :  { %3282 = vmatprep.mubr.msk.f32.mxu1 %vm1359_vm12, %v2216_v43 }
 0xb20   :  { %3283 = vmatmul.mubr.msk.f32.vlgmr.msra.gmra.mrb[20].mxu1 %vm1359_vm12, %v2217_v24 }
 0xb21   :  { %3302 = vmatprep.mubr.msk.f32.mxu1 %vm692_vm3, %v3816_v20 }
 0xbf3   :  { %v3284_v60 = vpop.f32.mrb[20].mxu1 }
 0xbf4   :  { %v2302_v50 = vadd.f32 %v3284_v60, %v2949_v49  ;;  %v2296_v54 = vpop.f32.mrb[21].mxu1 }
 0xbf5   :  { %v2297_v61 = vadd.f32 %v2949_v49, %v2296_v54 }
 0xbf6   :  { %v2316_v26 = vand.u32 2147483647, %v2302_v50  ;;  %v2314_v38 = vmax.f32 %v2302_v50, 0.0  ;;  %v2306_v52 = vmul.f32 0.5, %v2302_v50 }
 0xbf7   :  { %v2315_v21 = vand.u32 2147483647, %v2297_v61  ;;  %v2313_v15 = vmax.f32 %v2297_v61, 0.0  ;;  %v2305_v23 = vmul.f32 0.5, %v2297_v61 }
 0xbf8   :  { %v2318_v63 = vsub.f32 0.0, %v2316_v26 }
 0xbf9   :  { %v2317_v62 = vsub.f32 0.0, %v2315_v21 }
 0xbfa   :  { %v2321_v40 = vmul.f32 1.442695, %v2318_v63 }
 0xbfb   :  { %v2319_v29 = vmul.f32 1.442695, %v2317_v62 }
 0xbfc   :  { %3565 = vpow2.f32 %v2321_v40 }
 0xbfd   :  { %3567 = vpow2.f32 %v2319_v29 }
 0xc06   :  { %v3566_v7 = vpop.eup %3565 }
 0xc07   :  { %v3568_v3 = vpop.eup %3567  ;;  %v2332_v59 = vadd.f32 1.0, %v3566_v7  ;;  %v2335_v27 = vmul.f32 -0.5, %v3566_v7  ;;  %v2338_v37 = vand.u32 2147483647, %v3566_v7 }
 0xc08   :  { %v2323_v20 = vadd.f32 1.0, %v3568_v3  ;;  %v2326_v48 = vmul.f32 -0.5, %v3568_v3  ;;  %v2329_v18 = vand.u32 2147483647, %v3568_v3 }
 0xc09   :  { %3569 = vlog2.f32 %v2332_v59  ;;  %v2336_v9 = vadd.f32 1.0, %v2335_v27  ;;  %vm2339_vm9 = vcmp.lt.f32.partialorder %v2338_v37, 0.0004427343  ;;  %v1152_v59 = vadd.f32 %v4221_v25, %v4197_v30 }
 0xc0a   :  { %3571 = vlog2.f32 %v2323_v20  ;;  %v2327_v22 = vadd.f32 1.0, %v2326_v48  ;;  %vm2330_vm13 = vcmp.lt.f32.partialorder %v2329_v18, 0.0004427343  ;;  %v1147_v20 = vadd.f32 %v4197_v30, %v4223_v14 }
 0xc0b   :  { %v2337_v34 = vmul.f32 %v3566_v7, %v2336_v9  ;;  %3573 = vtanh.f32 %v2306_v52 }
 0xc0c   :  { %v2328_v1 = vmul.f32 %v3568_v3, %v2327_v22  ;;  %3575 = vtanh.f32 %v2305_v23 }
 0xc13   :  { %v3570_v42 = vpop.eup %3569 }
 0xc14   :  { %v3572_v12 = vpop.eup %3571  ;;  %v2334_v44 = vmul.f32 0.6931472, %v3570_v42 }
 0xc15   :  { %v2325_v41 = vmul.f32 0.6931472, %v3572_v12  ;;  %v3574_v31 = vpop.eup %3573 }
 0xc16   :  { %v2340_v5 = vsel %vm2339_vm9, %v2337_v34, %v2334_v44  ;;  %v3576_v11 = vpop.eup %3575  ;;  %v2310_v16 = vadd.f32 1.0, %v3574_v31 }
 0xc17   :  { %v2342_v53 = vadd.f32 %v2340_v5, %v2314_v38  ;;  %v2331_v55 = vsel %vm2330_vm13, %v2328_v1, %v2325_v41  ;;  %v2309_v35 = vadd.f32 1.0, %v3576_v11  ;;  %v2953_v1 = vld [vmem:[%s4589_s18 + $0x1] ss:$0 sm:$0xff] }
 0xc18   :  { %v2341_v51 = vadd.f32 %v2331_v55, %v2313_v15  ;;  %v2312_v57 = vmul.f32 0.5, %v2310_v16 }
 0xc19   :  { %2347 = vrot.lane.b32.xlu0 %v2342_v53, %s3665_s26  ;;  %v2311_v39 = vmul.f32 0.5, %v2309_v35 }
 0xc1a   :  { %2345 = vrot.lane.b32.xlu1 %v2341_v51, %s3665_s26 }
 0xc8b   :  { %v2348_v58 = vpop.permute.xlu0 %2347 }
 0xc8c   :  { %v2352_v43 = vmul.f32 %v2348_v58, %v2312_v57  ;;  %v2346_v24 = vpop.permute.xlu1 %2345 }
 0xc8d   :  { %v2351_v49 = vmul.f32 %v2346_v24, %v2311_v39 }
 0xc8e   :  { %v2356_v60 = vsel %vm919_vm10, %v2352_v43, 0.0 }
 0xc8f   :  { %2357 = vadd.xlane.f32.xlu0 %v2356_v60  ;;  %v2353_v54 = vsel %vm919_vm10, %v2351_v49, 0.0 }
 0xc90   :  { %2354 = vadd.xlane.f32.xlu1 %v2353_v54 }
 0xd1c   :  { %v2358_v50 = vpop.xlane.xlu0 %2357 }
 0xd1d   :  { %v2360_v61 = vmul.f32 0.03125, %v2358_v50  ;;  %v2355_v26 = vpop.xlane.xlu1 %2354 }
 0xd1e   :  { %v2359_v21 = vmul.f32 0.03125, %v2355_v26 }
 0xd1f   :  { %v2362_v63 = vsub.f32 %v2352_v43, %v2360_v61 }
 0xd20   :  { %v2361_v62 = vsub.f32 %v2351_v49, %v2359_v21 }
 0xd21   :  { %v2364_v40 = vmul.f32 %v2362_v63, %v2362_v63 }
 0xd22   :  { %v2363_v29 = vmul.f32 %v2361_v62, %v2361_v62 }
 0xd23   :  { %v2368_v7 = vsel %vm919_vm10, %v2364_v40, 0.0 }
 0xd24   :  { %2369 = vadd.xlane.f32.xlu1 %v2368_v7  ;;  %v2365_v3 = vsel %vm919_vm10, %v2363_v29, 0.0 }
 0xd25   :  { %2366 = vadd.xlane.f32.xlu0 %v2365_v3 }
 0xd35   :  { %1785 = vrot.lane.b32.xlu1 %v1152_v59, %s3663_s9 }
 0xd39   :  { %1799 = vrot.lane.b32.xlu1 %v4340_v36, %s3664_s5 }
 0xd3b   :  { %1783 = vrot.lane.b32.xlu0 %v1147_v20, %s3663_s9 }
 0xd3f   :  { %1801 = vrot.lane.b32.xlu0 %v4338_v0, %s3664_s5 }
 0xdb1   :  { %v2370_v27 = vpop.xlane.xlu1 %2369 }
 0xdb2   :  { %v2372_v48 = vmul.f32 0.03125, %v2370_v27  ;;  %v2367_v9 = vpop.xlane.xlu0 %2366  ;;  %v2930_v27 = vld [vmem:[%s4586_s15 + $0x60] sm:$0xff] }
 0xdb3   :  { %v2371_v37 = vmul.f32 0.03125, %v2367_v9  ;;  %v2932_v9 = vld [vmem:[%s4586_s15 + $0x70] sm:$0xff] }
 0xdb4   :  { %v2374_v22 = vadd.f32 1e-05, %v2372_v48  ;;  %v2931_v48 = vld [vmem:[%s4586_s15 + $0x68] sm:$0xff] }
 0xdb5   :  { %v2373_v18 = vadd.f32 1e-05, %v2371_v37  ;;  %v1786_v25 = vpop.permute.xlu1 %1785  ;;  %v3440_v37 = vpack.c.bf16 %v2931_v48, %v2930_v27 }
 0xdb6   :  { %3577 = vrsqrt.f32 %v2374_v22  ;;  %v1784_v42 = vpop.permute.xlu0 %1783  ;;  %v1810_v36 = vsel %vm919_vm10, %v4328_v56, %v1786_v25  ;;  %v2934_v25 = vld [vmem:[%s4586_s15 + $0x80] sm:$0xff] }
 0xdb7   :  { %3579 = vrsqrt.f32 %v2373_v18  ;;  %v1809_v30 = vsel %vm919_vm10, %v4332_v45, %v1784_v42  ;;  %v2952_v45 = vld [vmem:[%s4588_s17 + $0x1] ss:$0 sm:$0xff]  ;;  %v2935_v42 = vld [vmem:[%s4586_s15 + $0x88] sm:$0xff] }
 0xdb9   :  { %v1800_v14 = vpop.permute.xlu1 %1799 }
 0xdba   :  { %v1813_v12 = vsel %vm924_vm11, %v1809_v30, %v1800_v14  ;;  %v1802_v0 = vpop.permute.xlu0 %1801 }
 0xdbb   :  { %v1814_v44 = vsel %vm924_vm11, %v1810_v36, %v1802_v0  ;;  %3245 = vmatprep.mubr.msk.f32.mxu0 %vm1359_vm12, %v1813_v12  ;;  %v3448_v36 = vpack.c.bf16 %v2935_v42, %v2934_v25  ;;  %v2936_v12 = vld [vmem:[%s4586_s15 + $0x90] sm:$0xff]  ;;  %v2937_v0 = vld [vmem:[%s4586_s15 + $0x98] sm:$0xff] }
 0xdbc   :  { %3246 = vmatmul.mubr.msk.f32.gmra.mrb[20].mxu0 %vm1359_vm12, %v1814_v44 }
 0xdbd   :  { %3289 = vmatprep.mubr.msk.f32.mxu0 %vm3654_vm1, %v3653_v2 }
 0xdc0   :  { %v3578_v34 = vpop.eup %3577 }
 0xdc1   :  { %v3580_v38 = vpop.eup %3579  ;;  %v2378_v41 = vmul.f32 %v3578_v34, %v2362_v63 }
 0xdc2   :  { %v2377_v56 = vmul.f32 %v3580_v38, %v2361_v62  ;;  %v3452_v38 = vpack.c.bf16 %v2937_v0, %v2936_v12 }
 0xdc3   :  { %v2386_v15 = vmul.f32 %v2952_v45, %v2378_v41 }
 0xdc4   :  { %v2385_v5 = vmul.f32 %v2952_v45, %v2377_v56 }
 0xdc5   :  { %v2394_v53 = vadd.f32 %v2953_v1, %v2386_v15  ;;  %v2939_v15 = vld [vmem:[%s4586_s15 + $0xa8] sm:$0xff] }
 0xdc6   :  { %v2393_v55 = vadd.f32 %v2953_v1, %v2385_v5  ;;  %v2938_v1 = vld [vmem:[%s4586_s15 + $0xa0] sm:$0xff] }
 0xdc8   :  { %v3438_v51 = vpack.c.bf16 %v2394_v53, %v2393_v55  ;;  %v3456_v53 = vpack.c.bf16 %v2939_v15, %v2938_v1  ;;  %v2940_v55 = vld [vmem:[%s4586_s15 + $0xb0] sm:$0xff] }
 0xdca   :  { %3439 = vmatpush3.bf16.msra.mxu0 %v3438_v51  ;;  %v2941_v51 = vld [vmem:[%s4586_s15 + $0xb8] sm:$0xff] }
 0xdcd   :  { %3290 = vmatmul.mubr.msk.f32.vlgmr.msra.gmra.mrb[22].mxu0 %vm1532_vm6, %v4250_v46 }
 0xdce   :  { %3294 = vmatprep.mubr.msk.f32.mxu0 %vm692_vm3, %v3813_v19 }
 0xe8f   :  { %v3247_v2 = vpop.f32.mrb[20].mxu0 }
 0xe90   :  { %v1915_v52 = vadd.f32 %v3247_v2, %v4351_v33  ;;  %v1909_v23 = vpop.f32.mrb[21].mxu0  ;;  %v3460_v2 = vpack.c.bf16 %v2941_v51, %v2940_v55 }
 0xe91   :  { %v1910_v31 = vadd.f32 %v4351_v33, %v1909_v23 }
 0xe92   :  { %v1941_v11 = vand.u32 2147483647, %v1915_v52  ;;  %v1937_v62 = vmax.f32 %v1915_v52, 0.0 }
 0xe93   :  { %v1940_v16 = vand.u32 2147483647, %v1910_v31  ;;  %v1936_v29 = vmax.f32 %v1910_v31, 0.0  ;;  %v1920_v20 = vmul.f32 0.5, %v1910_v31 }
 0xe94   :  { %v1945_v35 = vsub.f32 0.0, %v1941_v11 }
 0xe95   :  { %v1944_v57 = vsub.f32 0.0, %v1940_v16 }
 0xe96   :  { %v1952_v58 = vmul.f32 1.442695, %v1945_v35 }
 0xe97   :  { %v1950_v39 = vmul.f32 1.442695, %v1944_v57 }
 0xe98   :  { %3581 = vpow2.f32 %v1952_v58 }
 0xe99   :  { %3583 = vpow2.f32 %v1950_v39 }
 0xea0   :  { %v2461_v43 = vpop.f32.mrb[22].mxu0 }
 0xea1   :  { %v2465_v46 = vadd.f32 %v2461_v43, %v4257_v4  ;;  %v3291_v24 = vpop.f32.mrb[23].mxu0 }
 0xea2   :  { %v3582_v49 = vpop.eup %3581 }
 0xea3   :  { %v3584_v19 = vpop.eup %3583  ;;  %2823 = vst.msk [vmem:[#allocation2] sm:$0xff] %vm919_vm10, %v2465_v46  ;;  %3292 = vmatprep.subr.mxu0 %v2465_v46  ;;  %3300 = vmatprep.subr.mxu1 %v2465_v46  ;;  %v1981_v60 = vadd.f32 1.0, %v3582_v49  ;;  %v1984_v4 = vmul.f32 -0.5, %v3582_v49  ;;  %v1987_v50 = vand.u32 2147483647, %v3582_v49 }
 0xea4   :  { %3293 = vmatpush3.msra.mxu0 %v2465_v46  ;;  %3301 = vmatpush3.msra.mxu1 %v2465_v46  ;;  %v1972_v33 = vadd.f32 1.0, %v3584_v19  ;;  %v1975_v54 = vmul.f32 -0.5, %v3584_v19 }
 0xea5   :  { %3295 = vmatmul.mubr.msk.f32.vlgmr.msra.gmra.mrb[24].mxu0 %vm692_vm3, %v3890_v13  ;;  %3303 = vmatmul.mubr.msk.f32.vlgmr.msra.gmra.mrb[22].mxu1 %vm692_vm3, %v3879_v10  ;;  %3585 = vlog2.f32 %v1981_v60  ;;  %v1985_v13 = vadd.f32 1.0, %v1984_v4  ;;  %v1978_v10 = vand.u32 2147483647, %v3584_v19  ;;  %vm1988_vm1 = vcmp.lt.f32.partialorder %v1987_v50, 0.0004427343 }
 0xea6   :  { %3297 = vmatprep.mubr.msk.f32.mxu0 %vm692_vm3, %v3967_v32  ;;  %3305 = vmatprep.mubr.msk.f32.mxu1 %vm692_vm3, %v3875_v8  ;;  %3587 = vlog2.f32 %v1972_v33  ;;  %v1976_v61 = vadd.f32 1.0, %v1975_v54 }
 0xea7   :  { %v1986_v32 = vmul.f32 %v3582_v49, %v1985_v13  ;;  %vm1979_vm14 = vcmp.lt.f32.partialorder %v1978_v10, 0.0004427343  ;;  %3441 = vmatprep.subr.bf16.mxu0 %v3440_v37 }
 0xea8   :  { %v1977_v40 = vmul.f32 %v3584_v19, %v1976_v61  ;;  %3443 = vmatpush3.bf16.msra.mxu0 %v3440_v37 }
 0xea9   :  { %3298 = vmatmul.mubr.msk.f32.gmra.mrb[26].mxu0 %vm692_vm3, %v3982_v47  ;;  %3306 = vmatmul.mubr.msk.f32.gmra.mrb[24].mxu1 %vm692_vm3, %v3895_v17  ;;  %v1921_v17 = vmul.f32 0.5, %v1915_v52 }
 0xeab   :  { %3589 = vtanh.f32 %v1921_v17 }
 0xeac   :  { %3591 = vtanh.f32 %v1920_v20 }
 0xeaf   :  { %v3586_v26 = vpop.eup %3585 }
 0xeb0   :  { %v3588_v21 = vpop.eup %3587  ;;  %v1983_v63 = vmul.f32 0.6931472, %v3586_v26 }
 0xeb1   :  { %v1974_v8 = vmul.f32 0.6931472, %v3588_v21 }
 0xeb2   :  { %v1989_v7 = vsel %vm1988_vm1, %v1986_v32, %v1983_v63 }
 0xeb3   :  { %v1993_v47 = vadd.f32 %v1989_v7, %v1937_v62  ;;  %v1980_v3 = vsel %vm1979_vm14, %v1977_v40, %v1974_v8  ;;  %v2963_v62 = vld [vmem:[%s4587_s16 + $0x1] ss:$0 sm:$0xff]  ;;  %s3667_s16 = smov [#allocation2]  }
 0xeb4   :  { %v1992_v59 = vadd.f32 %v1980_v3, %v1936_v29 }
 0xeb5   :  { %2004 = vrot.lane.b32.xlu0 %v1993_v47, %s3665_s26 }
 0xeb6   :  { %2002 = vrot.lane.b32.xlu1 %v1992_v59, %s3665_s26 }
 0xeb9   :  { %2640 = vrot.lane.b32.xlu0 %v4407_v28, %s3663_s9  ;;  %v3590_v28 = vpop.eup %3589 }
 0xeba   :  { %2638 = vrot.lane.b32.xlu1 %v4409_v6, %s3663_s9  ;;  %v2933_v6 = vld [vmem:[%s4586_s15 + $0x78] sm:$0xff]  ;;  %v3592_v22 = vpop.eup %3591  ;;  %v1929_v30 = vadd.f32 1.0, %v3590_v28 }
 0xebb   :  { %v3444_v18 = vpack.c.bf16 %v2933_v6, %v2932_v9  ;;  %v1928_v14 = vadd.f32 1.0, %v3592_v22 }
 0xebc   :  { %v1933_v44 = vmul.f32 0.5, %v1929_v30 }
 0xebd   :  { %3445 = vmatprep.subr.bf16.mxu0 %v3444_v18  ;;  %v1932_v45 = vmul.f32 0.5, %v1928_v14 }
 0xebe   :  { %3447 = vmatpush3.bf16.msra.mxu0 %v3444_v18 }
 0xebf   :  { %3449 = vmatprep.subr.bf16.mxu0 %v3448_v36 }
 0xec2   :  { %3451 = vmatpush3.bf16.msra.mxu0 %v3448_v36 }
 0xec3   :  { %3453 = vmatprep.subr.bf16.mxu0 %v3452_v38 }
 0xec6   :  { %3455 = vmatpush3.bf16.msra.mxu0 %v3452_v38 }
 0xec7   :  { %3457 = vmatprep.subr.bf16.mxu0 %v3456_v53 }
 0xeca   :  { %3459 = vmatpush3.bf16.msra.mxu0 %v3456_v53 }
 0xecb   :  { %3461 = vmatprep.subr.bf16.mxu0 %v3460_v2 }
 0xece   :  { %3463 = vmatpush3.bf16.msra.mxu0 %v3460_v2 }
 0xf27   :  { %v2005_v34 = vpop.permute.xlu0 %2004 }
 0xf28   :  { %v2013_v41 = vmul.f32 %v2005_v34, %v1933_v44  ;;  %v2003_v56 = vpop.permute.xlu1 %2002 }
 0xf29   :  { %v2012_v5 = vmul.f32 %v2003_v56, %v1932_v45 }
 0xf2a   :  { %2644 = vrot.lane.b32.xlu0 %v2013_v41, %s3663_s9 }
 0xf2b   :  { %2642 = vrot.lane.b32.xlu1 %v2012_v5, %s3663_s9  ;;  %v2641_v39 = vpop.permute.xlu0 %2640 }
 0xf2c   :  { %v2639_v43 = vpop.permute.xlu1 %2638 }
 0xf78   :  { %v3296_v52 = vpop.f32.mrb[24].mxu0  ;;  %v3304_v23 = vpop.f32.mrb[22].mxu1 }
 0xf79   :  { %2656 = vrot.lane.b32.xlu0 %v3304_v23, %s3664_s5  ;;  %v2532_v31 = vpop.f32.mrb[25].mxu0  ;;  %v2617_v11 = vpop.f32.mrb[23].mxu1  ;;  %v2667_v33 = vsel %vm919_vm10, %v3296_v52, %v2641_v39 }
 0xf7a   :  { %2654 = vrot.lane.b32.xlu1 %v2617_v11, %s3664_s5  ;;  %v2666_v19 = vsel %vm919_vm10, %v2532_v31, %v2639_v43 }
 0xf7c   :  { %v3299_v16 = vpop.f32.mrb[26].mxu0  ;;  %v3307_v35 = vpop.f32.mrb[24].mxu1 }
 0xf7d   :  { %2660 = vrot.lane.b32.xlu0 %v3307_v35, %s3664_s5  ;;  %v2542_v57 = vpop.f32.mrb[27].mxu0  ;;  %v2627_v58 = vpop.f32.mrb[25].mxu1 }
 0xf7e   :  { %2658 = vrot.lane.b32.xlu1 %v2627_v58, %s3664_s5  ;;  %s2832_s5 = sshll.u32 %s3667_s16, 4  ;;  %s2833_s5 = int_to_ptr.vmem [resolvable:$true] %s2832_s5 }
 0xf7f   :  { %s3605_s17 = scalar_lea.vmem %s2833_s5, 128  ;;  %p3610_p1 = scmp.lt.s32.totalorder %s2833_s5, %s2833_s5 }
 0xf80   :  { %p3606_p0 = scmp.ne.s32.totalorder %s2833_s5, %s3605_s17  ;;  %p3611_p2 = scmp.lt.s32.totalorder %s3605_s17, %s3605_s17 }
 0xf82   :  { %p3612_p3 = por %p3611_p2, %p3610_p1 }
 0xf84   :  { %p3613_p4 = pnand %p3612_p3, %p3606_p0 }
 0xf9c   :  { %v2645_v46 = vpop.permute.xlu0 %2644 }
 0xf9d   :  { %v2643_v24 = vpop.permute.xlu1 %2642  ;;  %v2669_v10 = vsel %vm919_vm10, %v3299_v16, %v2645_v46 }
 0xf9e   :  { %v2668_v50 = vsel %vm919_vm10, %v2542_v57, %v2643_v24 }
 0xfeb   :  { %v2657_v49 = vpop.permute.xlu0 %2656 }
 0xfec   :  { %v2655_v60 = vpop.permute.xlu1 %2654  ;;  %v2671_v54 = vsel %vm924_vm11, %v2667_v33, %v2657_v49 }
 0xfed   :  { %v2670_v4 = vsel %vm924_vm11, %v2666_v19, %v2655_v60 }
 0xfee   :  { %3332 = vmatprep.mubr.msk.f32.mxu0 %vm1359_vm12, %v2670_v4 }
 0xfef   :  { %v2661_v13 = vpop.permute.xlu0 %2660  ;;  %3333 = vmatmul.mubr.msk.f32.vlgmr.msra.gmra.mrb[28].mxu0 %vm1359_vm12, %v2671_v54 }
 0xff0   :  { %v2659_v61 = vpop.permute.xlu1 %2658  ;;  %v2673_v21 = vsel %vm924_vm11, %v2669_v10, %v2661_v13 }
 0xff1   :  { %v2672_v26 = vsel %vm924_vm11, %v2668_v50, %v2659_v61 }
 0xff2   :  { %3335 = vmatprep.mubr.msk.f32.mxu0 %vm1359_vm12, %v2672_v26 }
 0xff3   :  { %3336 = vmatmul.mubr.msk.f32.gmra.mrb[30].mxu0 %vm1359_vm12, %v2673_v21 }
0x10c2   :  { %v3334_v63 = vpop.f32.mrb[28].mxu0 }
0x10c3   :  { %v2758_v32 = vpop.f32.mrb[29].mxu0 }
0x10c6   :  { %v3337_v8 = vpop.f32.mrb[30].mxu0 }
0x10c7   :  { %v2772_v40 = vadd.f32 %v3337_v8, %v2963_v62  ;;  %v2766_v29 = vpop.f32.mrb[31].mxu0 }
0x10c8   :  { %v2767_v7 = vadd.f32 %v2963_v62, %v2766_v29 }
0x10c9   :  { %v2786_v47 = vand.u32 2147483647, %v2772_v40 }
0x10ca   :  { %v2785_v3 = vand.u32 2147483647, %v2767_v7 }
0x10cb   :  { %v2788_v59 = vsub.f32 0.0, %v2786_v47 }
0x10cc   :  { %v2787_v17 = vsub.f32 0.0, %v2785_v3 }
0x10cd   :  { %v2791_v20 = vmul.f32 1.442695, %v2788_v59 }
0x10ce   :  { %v2789_v27 = vmul.f32 1.442695, %v2787_v17 }
0x10cf   :  { %3593 = vpow2.f32 %v2791_v20 }
0x10d0   :  { %3595 = vpow2.f32 %v2789_v27 }
0x10d9   :  { %v3594_v48 = vpop.eup %3593 }
0x10da   :  { %v3596_v9 = vpop.eup %3595  ;;  %v2802_v28 = vadd.f32 1.0, %v3594_v48  ;;  %v2805_v6 = vmul.f32 -0.5, %v3594_v48  ;;  %v2808_v25 = vand.u32 2147483647, %v3594_v48 }
0x10db   :  { %v2793_v37 = vadd.f32 1.0, %v3596_v9  ;;  %v2796_v22 = vmul.f32 -0.5, %v3596_v9  ;;  %v2799_v30 = vand.u32 2147483647, %v3596_v9 }
0x10dc   :  { %3597 = vlog2.f32 %v2802_v28  ;;  %v2806_v18 = vadd.f32 1.0, %v2805_v6 }
0x10dd   :  { %3599 = vlog2.f32 %v2793_v37  ;;  %v2797_v42 = vadd.f32 1.0, %v2796_v22 }
0x10de   :  { %3616 = shalt.err (!%p3613_p4)
}
0x10df   :  { %s3617_s6 = scalar_lea.hbm %s4590_s19, 128 }
0x10e0   :  { %p3618_p5 = scmp.ne.s32.totalorder %s4590_s19, %s3617_s6  ;;  %p3621_p6 = scmp.lt.u32.totalorder %s3617_s6, %s4590_s19 }
0x10e2   :  { %p3623_p7 = pnand %p3621_p6, %p3618_p5 }
0x10e4   :  { %3626 = shalt.err (!%p3623_p7)
}
0x10e5   :  { %2835 = dma.vmem_to_hbm [thread:$0]  %s2833_s5, 128, %s4590_s19, [#allocation3]   ;;  %v2807_v0 = vmul.f32 %v3594_v48, %v2806_v18  ;;  %v2784_v44 = vmax.f32 %v2772_v40, 0.0  ;;  %vm2809_vm3 = vcmp.lt.f32.partialorder %v2808_v25, 0.0004427343  ;;  %v2798_v45 = vmul.f32 %v3596_v9, %v2797_v42 }
0x10e6   :  { %v3598_v14 = vpop.eup %3597  ;;  %v2783_v38 = vmax.f32 %v2767_v7, 0.0  ;;  %vm2800_vm11 = vcmp.lt.f32.partialorder %v2799_v30, 0.0004427343  ;;  %v2776_v5 = vmul.f32 0.5, %v2772_v40  ;;  %v2775_v53 = vmul.f32 0.5, %v2767_v7  ;;  %s3668_s19 = smov [#allocation4]  }
0x10e7   :  { %v3600_v36 = vpop.eup %3599  ;;  %v2804_v12 = vmul.f32 0.6931472, %v3598_v14  ;;  %s2841_s22 = sshll.u32 %s3668_s19, 4  ;;  %s2842_s22 = int_to_ptr.vmem [resolvable:$true] %s2841_s22 }
0x10e8   :  { %v2795_v34 = vmul.f32 0.6931472, %v3600_v36  ;;  %3601 = vtanh.f32 %v2776_v5  ;;  %p3632_p9 = scmp.lt.s32.totalorder %s2842_s22, %s2842_s22 }
0x10e9   :  { %v2810_v41 = vsel %vm2809_vm3, %v2807_v0, %v2804_v12  ;;  %3603 = vtanh.f32 %v2775_v53 }
0x10ea   :  { %v2812_v56 = vadd.f32 %v2810_v41, %v2784_v44  ;;  %v2801_v1 = vsel %vm2800_vm11, %v2798_v45, %v2795_v34 }
0x10eb   :  { %v2811_v15 = vadd.f32 %v2801_v1, %v2783_v38 }
0x10ec   :  { %2817 = vrot.lane.b32.xlu0 %v2812_v56, %s3665_s26 }
0x10ed   :  { %2815 = vrot.lane.b32.xlu1 %v2811_v15, %s3665_s26  ;;  %s3627_s26 = scalar_lea.vmem %s2842_s22, 256 }
0x10ee   :  { %p3628_p8 = scmp.ne.s32.totalorder %s2842_s22, %s3627_s26  ;;  %p3633_p10 = scmp.lt.s32.totalorder %s3627_s26, %s3627_s26 }
0x10f0   :  { %p3634_p11 = por %p3633_p10, %p3632_p9 }
0x10f2   :  { %v3602_v55 = vpop.eup %3601  ;;  %p3635_p12 = pnand %p3634_p11, %p3628_p8 }
0x10f3   :  { %v3604_v51 = vpop.eup %3603  ;;  %v2780_v2 = vadd.f32 1.0, %v3602_v55 }
0x10f4   :  { %v2779_v52 = vadd.f32 1.0, %v3604_v51 }
0x10f5   :  { %v2782_v23 = vmul.f32 0.5, %v2780_v2 }
0x10f6   :  { %v2781_v11 = vmul.f32 0.5, %v2779_v52 }
0x115e   :  { %v2818_v31 = vpop.permute.xlu0 %2817 }
0x115f   :  { %v2822_v16 = vmul.f32 %v2818_v31, %v2782_v23  ;;  %v2816_v35 = vpop.permute.xlu1 %2815 }
0x1160   :  { %v2821_v57 = vmul.f32 %v2816_v35, %v2781_v11 }
0x1161   :  { %2825 = vst.msk [vmem:[#allocation4 + $0x8] sm:$0xff] %vm919_vm10, %v2822_v16 }
0x1162   :  { %2824 = vst.msk [vmem:[#allocation4] sm:$0xff] %vm919_vm10, %v2821_v57 }
0x1163   :  { %3638 = shalt.err (!%p3635_p12)
}
0x1164   :  { %s3639_s10 = scalar_lea.hbm %s4591_s20, 256 }
0x1165   :  { %p3640_p13 = scmp.ne.s32.totalorder %s4591_s20, %s3639_s10  ;;  %p3643_p0 = scmp.lt.u32.totalorder %s3639_s10, %s4591_s20 }
0x1167   :  { %p3645_p1 = pnand %p3643_p0, %p3640_p13 }
0x1169   :  { %3648 = shalt.err (!%p3645_p1)
}
0x116a   :  { %s3669_s13 = smov 128   ;;  %s3670_s3 = smov 8  }
0x116b   :  { %2847 = dma.vmem_to_hbm [thread:$0]  %s2842_s22, 256, %s4591_s20, [#allocation5], %s3669_s13, %s3669_s13, %s3670_s3  }
0x116c   :  { %3649 = dma.done.wait [#allocation3], 128  }
0x116d   :  { %3650 = vsyncadd [#allocation3], 4294967168 }
0x116e   :  { %3651 = dma.done.wait [#allocation5], 256  }
0x116f   :  { %3652 = vsyncadd [#allocation5], 4294967040 }
0x1170   :  { %2854 = vsyncpa [#allocation3], 1 }
0x1171   :  { %2855 = vsyncpa [#allocation5], 1 }

</bundles_post_ra>
